<compile_context>
chip_gen: v7x
topology: tpu7x:2x2x1
jax: 0.10.0
libtpu: 0.0.40
codegen_flags: <defaults>
</compile_context>

<pallas_src>
import functools
import math

import jax
import jax.numpy as jnp
from jax.experimental import pallas as pl
from jax.experimental.pallas import tpu as pltpu


# ----------------------------- small jnp helpers (usable in-kernel) -----------------------------
def _silu(x):
    return x * jax.nn.sigmoid(x)


def _layernorm(x, gamma, beta, eps=1e-5):
    mu = jnp.mean(x, axis=-1, keepdims=True)
    xc = x - mu
    var = jnp.mean(xc * xc, axis=-1, keepdims=True)
    return xc * jax.lax.rsqrt(var + eps) * gamma + beta


# ----------------------------- the single fused GPGIN kernel -----------------------------
def gpgin_fused_kernel(efm_ref, emb_ref,
                       ew1_ref, eb1_ref, eg1_ref, ebt1_ref, ew2_ref, eb2_ref, ale_ref,
                       nw1_ref, nb1_ref, ng1_ref, nbt1_ref, nw2_ref, nb2_ref, nfg_ref, nfb_ref,
                       gw_ref, gb_ref, gms_ref,
                       out_ref, h_scr, n2_scr,
                       *, np_, n_real, tn, g, n_layers, alphas):
    l = pl.program_id(0)                # layer index (outer, sequential)
    b = pl.program_id(1)                # node-block index (inner, sequential)
    nb = pl.num_programs(1)
    row0 = pl.multiple_of(b * tn, 8)    # tn is always a multiple of 8 (Np padded in wrapper)

    # One-time init of the running node features from the atom-type embeddings.
    @pl.when((l == 0) & (b == 0))
    def _():
        h_scr[...] = emb_ref[...]

    x = h_scr[...]                           # [Np, D]  current-layer input, all nodes
    xb = h_scr[pl.ds(row0, tn), :]           # [tn, D]  rows owned by this block

    efm = efm_ref[...]                       # [te, G+1] f32: gaussians | adjacency-mask column
    ef = efm[:, :g].astype(jnp.bfloat16)     # [te, G]   (bf16 only for the MXU operand)
    mask = efm[:, g:g + 1]                   # [te, 1]   0/1 adjacency (incl. self loops)

    # ---- edge MLP: Linear -> LayerNorm -> SiLU -> Linear (bf16 MXU operands, f32 accumulation) ----
    # (G=16 under-fills the MXU contraction; acceptable here since the kernel is not MXU-bound.)
    e1 = jnp.dot(ef, ew1_ref[0], preferred_element_type=jnp.float32) + eb1_ref[0]
    e1 = _silu(_layernorm(e1, eg1_ref[0], ebt1_ref[0]))
    e2 = jnp.dot(e1.astype(jnp.bfloat16), ew2_ref[0],
                 preferred_element_type=jnp.float32) + eb2_ref[0]            # [te, D]

    # ---- message passing (no O(N^3) helper matmuls):
    #      h0[i] = sum_j adj[i, j] * x[j] * edge_attr[(i, j)]
    d = e2.shape[-1]
    msg = (e2 * mask).reshape(tn, np_, d) * x[None, :, :]                    # [tn, Np, D]
    h0 = jnp.sum(msg, axis=1)                                                # [tn, D]

    pre = ale_ref[0] * h0 + xb                                               # ConvLayer.alpha * h0 + x

    # ---- node MLP: Linear -> LayerNorm -> SiLU -> Linear (-> LayerNorm -> SiLU unless last) ----
    n1 = jnp.dot(pre.astype(jnp.bfloat16), nw1_ref[0],
                 preferred_element_type=jnp.float32) + nb1_ref[0]
    n1 = _silu(_layernorm(n1, ng1_ref[0], nbt1_ref[0]))
    n2 = jnp.dot(n1.astype(jnp.bfloat16), nw2_ref[0],
                 preferred_element_type=jnp.float32) + nb2_ref[0]            # [tn, D]
    n2 = jnp.where(l < n_layers - 1,
                   _silu(_layernorm(n2, nfg_ref[0], nfb_ref[0])),            # non-last conv
                   n2)                                                       # last conv: Identity
    n2_scr[pl.ds(row0, tn), :] = n2

    # ---- end-of-layer finalize (runs at the last node block of each layer) ----
    ga = jnp.float32(alphas[0])                 # GPGIN.alpha[l]: static values, runtime layer idx
    for li in range(1, n_layers):
        ga = jnp.where(l == li, jnp.float32(alphas[li]), ga)

    @pl.when((b == nb - 1) & (l < n_layers - 1))
    def _():
        # GraphNorm over the real nodes only (padded rows masked out) + SiLU + residual.
        hc = n2_scr[...]                                                     # [Np, D]
        rows = jax.lax.broadcasted_iota(jnp.int32, (np_, 1), 0)
        m = (rows < n_real).astype(jnp.float32)
        inv_n = jnp.float32(1.0 / n_real)
        mu = jnp.sum(hc * m, axis=0, keepdims=True) * inv_n
        c = hc - mu * gms_ref[0]
        var = jnp.sum(c * c * m, axis=0, keepdims=True) * inv_n
        hn = _silu(gw_ref[0] * c * jax.lax.rsqrt(var + 1e-5) + gb_ref[0])
        h_scr[...] = h_scr[...] + ga * hn                                    # h = h + alpha[l] * h_

    @pl.when((b == nb - 1) & (l == n_layers - 1))
    def _():
        # Last layer: no GraphNorm / activation; write the whole resident output once.
        out_ref[...] = h_scr[...] + ga * n2_scr[...]


# ----------------------------- generation-aware node-block / VMEM budget -----------------------------
def _pick_node_block(np_, g, h, d, n_layers, block_cap=None):
    """Pick the node-block size tn (multiple of 8 dividing Np) and an explicit VMEM limit from an
    honest per-generation budget: lane padding to 128, the double-buffered f32 efm stream, the live
    f32/bf16 [te, H]/[te, D] edge/node-MLP intermediates, double-buffered stacked weights, the
    resident embedding/output blocks and the two (Np, D) scratches."""
    def lanes(w):
        return ((max(int(w), 1) + 127) // 128) * 128

    try:
        cap = int(pltpu.get_tpu_info().vmem_capacity_bytes)   # 64 MiB v7x, 128 MiB v5e/v6e
    except Exception:
        cap = 64 * 1024 * 1024                                # conservative (v7x) fallback
    budget = cap // 2                                         # headroom for compiler temps / spills

    we, wh, wd = lanes(g + 1), lanes(h), lanes(d)
    # stacked per-layer weights: their index map moves with the layer axis -> double-buffered.
    w_words = n_layers * (g * wh + h * wd + d * wh + h * wd   # 4 matmul weights (counted as f32: margin)
                          + 8 * (6 * wh + 8 * wd))            # bias / norm rows, 8-sublane padded
    resident = 4 * (2 * np_ * wd                              # embedding input (double-buffered)
                    + np_ * wd                                # output buffer
                    + 2 * np_ * wd                            # h_scr + n2_scr
                    + 2 * w_words)                            # stacked weights (double-buffered)

    def per_block_bytes(t):
        te = t * np_
        return (4 * te * we * 2          # efm stream, f32, double-buffered
                + 2 * te * we            # ef bf16 cast
                + 4 * te * wh            # e1 f32
                + 2 * te * wh            # e1 bf16 cast
                + 3 * 4 * te * wd        # e2, masked e2, msg [tn, Np, D]
                + 8 * 4 * t * wd)        # small [tn, H]/[tn, D] temps (slack)

    cands = [t for t in range(8, np_ + 1, 8) if np_ % t == 0]
    if block_cap is not None:
        capped = [t for t in cands if t <= block_cap]
        cands = capped if capped else cands[:1]
    tn = cands[0]
    for t in cands:
        if resident + per_block_bytes(t) <= budget:
            tn = t                                            # largest candidate that fits
    peak = resident + per_block_bytes(tn)
    vmem_limit = int(min(0.9 * cap, max(2 * peak, 32 * 1024 * 1024)))
    return tn, vmem_limit


# ----------------------------- GPGIN forward (glue in plain JAX + 1 pallas_call) -----------------------------
_WEIGHT_KEYS = ('ew1', 'eb1', 'eg1', 'ebt1', 'ew2', 'eb2', 'alpha_e',
                'nw1', 'nb1', 'ng1', 'nbt1', 'nw2', 'nb2', 'nfg', 'nfb',
                'gn_w', 'gn_b', 'gn_ms')
_MXU_KEYS = frozenset({'ew1', 'ew2', 'nw1', 'nw2'})


@functools.partial(jax.jit, static_argnames=("gpgin_alpha", "cutoff", "coeff", "block_cap"))
def gpgin_forward(params, gpgin_alpha, atom_type, pos, cutoff, coeff, block_cap=None):
    N = pos.shape[0]
    layers = params['layers']
    L = len(layers)
    G = params['offsets'].shape[1]
    H = layers[0]['ew1'].shape[1]
    D = layers[0]['nw2'].shape[1]
    Np = ((N + 7) // 8) * 8                           # pad node count to a sublane multiple

    # fused single-kernel path stacks per-layer weights -> identical per-layer MLP dims required
    # TODO(synk): heterogeneous per-layer hidden dims would need per-layer calls or padded stacks.
    for lp in layers:
        for k in _WEIGHT_KEYS:
            assert lp[k].shape == layers[0][k].shape, "per-layer MLP dims must match"

    # ---- plain-JAX prelude (runs once): radius graph + Gaussian smearing + embedding ----
    # TODO(synk): max_num_neighbors truncation of radius_graph (data-dependent top-k) is not
    #             implemented; at this scale every pair is within the cutoff anyway.
    diff = pos[:, None, :] - pos[None, :, :]
    dist = jnp.sqrt(jnp.sum(diff * diff, axis=-1))
    eye = jnp.eye(N, dtype=bool)
    adj = ((dist <= cutoff) | eye).astype(jnp.float32)        # [N, N]  (== (d<=c & ~I) | I)
    pad = Np - N
    dist_p = jnp.pad(dist, ((0, pad), (0, pad)))
    adj_p = jnp.pad(adj, ((0, pad), (0, pad)))                # padded nodes: no edges at all
    # per-edge stream: [Np^2, G+1] = [gaussian features | adjacency mask], f32, lane-dense.
    ef = jnp.exp(coeff * (dist_p.reshape(-1, 1) - params['offsets']) ** 2)
    efm = jnp.concatenate([ef, adj_p.reshape(-1, 1)], axis=1)

    h_emb = params['emb'][atom_type].astype(jnp.float32)      # [N, D] atom-type embeddings
    h_emb = jnp.pad(h_emb, ((0, pad), (0, 0)))

    # stacked per-layer weights (leading layer axis); bf16 only for the MXU operands
    stacked = [jnp.stack([lp[k] for lp in layers]).astype(
                   jnp.bfloat16 if k in _MXU_KEYS else jnp.float32)
               for k in _WEIGHT_KEYS]

    tn, vmem_limit = _pick_node_block(Np, G, H, D, L, block_cap)
    te = tn * Np
    nblocks = Np // tn

    in_specs = ([pl.BlockSpec((te, G + 1), lambda l, b: (b, 0)),          # efm: streamed per node block
                 pl.BlockSpec((Np, D), lambda l, b: (0, 0))]              # embeddings: resident
                + [pl.BlockSpec((1,) + w.shape[1:], lambda l, b: (l, 0, 0))   # weights: one layer/step
                   for w in stacked])
    out_spec = pl.BlockSpec((Np, D), lambda l, b: (0, 0))                 # resident; one dense writeback

    kernel = functools.partial(
        gpgin_fused_kernel, np_=Np, n_real=N, tn=tn, g=G, n_layers=L,
        alphas=tuple(float(a) for a in gpgin_alpha))

    h = pl.pallas_call(
        kernel,
        out_shape=jax.ShapeDtypeStruct((Np, D), jnp.float32),
        grid=(L, nblocks),
        in_specs=in_specs,
        out_specs=out_spec,
        scratch_shapes=[pltpu.VMEM((Np, D), jnp.float32),                 # running node features
                        pltpu.VMEM((Np, D), jnp.float32)],                # per-layer node-MLP output
        compiler_params=pltpu.CompilerParams(
            # Both axes sequential: the h / n2 scratches are carried across grid steps
            # (single-call fusion chosen over v7x megacore -- launch overhead dominates here).
            dimension_semantics=("arbitrary", "arbitrary"),
            vmem_limit_bytes=vmem_limit),
    )(efm, h_emb, *stacked)

    # batch=None path: h.mean((-2, -1)) over the real (unpadded) nodes
    return jnp.mean(h[:N])


# ----------------------------- pure-JAX f32 reference (for verification) -----------------------------
def gpgin_reference(params, gpgin_alpha, atom_type, pos, cutoff, coeff):
    N = pos.shape[0]
    L = len(params['layers'])
    diff = pos[:, None, :] - pos[None, :, :]
    dist = jnp.sqrt(jnp.sum(diff * diff, axis=-1))
    eye = jnp.eye(N, dtype=bool)
    adj = ((dist <= cutoff) | eye).astype(jnp.float32)
    ef = jnp.exp(coeff * (dist[:, :, None] - params['offsets'][0][None, None, :]) ** 2)   # [N,N,G]
    h = params['emb'][atom_type]
    for i, lp in enumerate(params['layers']):
        last = (i == L - 1)
        e1 = _silu(_layernorm(ef @ lp['ew1'] + lp['eb1'][0], lp['eg1'][0], lp['ebt1'][0]))
        e2 = e1 @ lp['ew2'] + lp['eb2'][0]                                                # [N,N,D]
        h0 = jnp.sum(adj[:, :, None] * h[None, :, :] * e2, axis=1)
        pre = lp['alpha_e'] * h0 + h
        n1 = _silu(_layernorm(pre @ lp['nw1'] + lp['nb1'], lp['ng1'], lp['nbt1']))
        n2 = n1 @ lp['nw2'] + lp['nb2']
        if not last:
            n2 = _silu(_layernorm(n2, lp['nfg'], lp['nfb']))
            mu = jnp.mean(n2, axis=0, keepdims=True)
            c = n2 - mu * lp['gn_ms']
            var = jnp.mean(c * c, axis=0, keepdims=True)
            n2 = _silu(lp['gn_w'] * c / jnp.sqrt(var + 1e-5) + lp['gn_b'])
        h = h + gpgin_alpha[i] * n2
    return jnp.mean(h)


# ----------------------------- deterministic parameter init -----------------------------
def _xavier(key, fan_in, fan_out):
    a = math.sqrt(6.0 / (fan_in + fan_out))
    return jax.random.uniform(key, (fan_in, fan_out), jnp.float32, -a, a)


def init_params(key, node_dimses, edge_dimses, cutoff):
    # NOTE: kernel assumes exactly one hidden layer per MLP (dims like [in, hid, out]).
    n_convs = len(node_dimses)
    emb_dim = node_dimses[0][0]
    G = edge_dimses[0][0]
    keys = iter(jax.random.split(key, 4 * n_convs + 2))
    params = {
        'emb': jax.random.normal(next(keys), (200, emb_dim), jnp.float32),   # nn.Embedding N(0,1)
        'offsets': jnp.linspace(0.0, cutoff, G, dtype=jnp.float32).reshape(1, G),
        'layers': [],
    }
    for li in range(n_convs):
        nd, ed = node_dimses[li], edge_dimses[li]
        lp = {
            # edge MLP
            'ew1': _xavier(next(keys), ed[0], ed[1]), 'eb1': jnp.zeros((1, ed[1]), jnp.float32),
            'eg1': jnp.ones((1, ed[1]), jnp.float32), 'ebt1': jnp.zeros((1, ed[1]), jnp.float32),
            'ew2': _xavier(next(keys), ed[1], ed[2]), 'eb2': jnp.zeros((1, ed[2]), jnp.float32),
            'alpha_e': jnp.full((1, ed[2]), 0.8, jnp.float32),
            # node MLP
            'nw1': _xavier(next(keys), nd[0], nd[1]), 'nb1': jnp.zeros((1, nd[1]), jnp.float32),
            'ng1': jnp.ones((1, nd[1]), jnp.float32), 'nbt1': jnp.zeros((1, nd[1]), jnp.float32),
            'nw2': _xavier(next(keys), nd[1], nd[2]), 'nb2': jnp.zeros((1, nd[2]), jnp.float32),
            'nfg': jnp.ones((1, nd[2]), jnp.float32), 'nfb': jnp.zeros((1, nd[2]), jnp.float32),
            # GraphNorm
            'gn_w': jnp.ones((1, nd[2]), jnp.float32), 'gn_b': jnp.zeros((1, nd[2]), jnp.float32),
            'gn_ms': jnp.ones((1, nd[2]), jnp.float32),
        }
        params['layers'].append(lp)
    return params


# ----------------------------- main -----------------------------
def _run_case(name, N, G, D, H, n_layers, cutoff=10.0, block_cap=None, seed=0):
    node_dimses = [[D, H, D]] * n_layers
    edge_dimses = [[G, H, D]] * n_layers
    gpgin_alpha = tuple([0.8] * n_layers)                 # GPGIN.alpha (constant 0.8)
    spacing = cutoff / (G - 1)
    coeff = -0.5 / (spacing ** 2)                         # GaussianSmearing coefficient

    key = jax.random.PRNGKey(seed)
    kp, ka, kpos = jax.random.split(key, 3)
    params = init_params(kp, node_dimses, edge_dimses, cutoff)
    atom_type = jax.random.randint(ka, (N,), 0, 200, dtype=jnp.int32)
    pos = jax.random.uniform(kpos, (N, 3), jnp.float32) * 4.0   # all pairs within the cutoff

    out = gpgin_forward(params, gpgin_alpha, atom_type, pos, cutoff, coeff, block_cap=block_cap)
    out = jax.block_until_ready(out)
    ref = gpgin_reference(params, gpgin_alpha, atom_type, pos, cutoff, coeff)
    assert jnp.isfinite(out), f"{name}: non-finite kernel output"
    # tolerance accounts for bf16 MXU operands in the Pallas path vs the f32 reference
    tol = 5e-2 * max(1.0, abs(float(ref)))
    assert abs(float(out) - float(ref)) < tol, f"{name}: pallas={float(out)} ref={float(ref)}"


if __name__ == "__main__":
    # primary config consistent with the GPGIN asserts: 8 nodes, 16 gaussians, D=32, H=64, 2 layers
    _run_case("small", N=8, G=16, D=32, H=64, n_layers=2)
    # ragged N (padded 20 -> 24), 3 layers, tn forced to 8 to exercise the multi-node-block path
    _run_case("padded_multiblock", N=20, G=16, D=32, H=64, n_layers=3, block_cap=8)
    print("KERNEL_OK")
</pallas_src>

<mosaic_0001>
module attributes {stable_mosaic.version = 11 : i64} {
  func.func @gpgin_fused_kernel(%arg0: i32, %arg1: i32, %arg2: memref<64x17xf32, #tpu.memory_space<vmem>>, %arg3: memref<8x32xf32, #tpu.memory_space<vmem>>, %arg4: memref<1x16x64xbf16, #tpu.memory_space<vmem>>, %arg5: memref<1x1x64xf32, #tpu.memory_space<vmem>>, %arg6: memref<1x1x64xf32, #tpu.memory_space<vmem>>, %arg7: memref<1x1x64xf32, #tpu.memory_space<vmem>>, %arg8: memref<1x64x32xbf16, #tpu.memory_space<vmem>>, %arg9: memref<1x1x32xf32, #tpu.memory_space<vmem>>, %arg10: memref<1x1x32xf32, #tpu.memory_space<vmem>>, %arg11: memref<1x32x64xbf16, #tpu.memory_space<vmem>>, %arg12: memref<1x1x64xf32, #tpu.memory_space<vmem>>, %arg13: memref<1x1x64xf32, #tpu.memory_space<vmem>>, %arg14: memref<1x1x64xf32, #tpu.memory_space<vmem>>, %arg15: memref<1x64x32xbf16, #tpu.memory_space<vmem>>, %arg16: memref<1x1x32xf32, #tpu.memory_space<vmem>>, %arg17: memref<1x1x32xf32, #tpu.memory_space<vmem>>, %arg18: memref<1x1x32xf32, #tpu.memory_space<vmem>>, %arg19: memref<1x1x32xf32, #tpu.memory_space<vmem>>, %arg20: memref<1x1x32xf32, #tpu.memory_space<vmem>>, %arg21: memref<1x1x32xf32, #tpu.memory_space<vmem>>, %arg22: memref<8x32xf32, #tpu.memory_space<vmem>>, %arg23: memref<8x32xf32, #tpu.memory_space<vmem>>, %arg24: memref<8x32xf32, #tpu.memory_space<vmem>>) attributes {dimension_semantics = [#tpu.dimension_semantics<arbitrary>, #tpu.dimension_semantics<arbitrary>], iteration_bounds = array<i64: 2, 1>, scalar_prefetch = 0 : i64, scratch_operands = 2 : i64, tpu.core_type = #tpu.core_type<tc>, window_params = [{transform_indices = @transform_0, window_bounds = array<i64: 64, 17>}, {pipeline_mode = #tpu.pipeline_mode<synchronous>, transform_indices = @transform_1, window_bounds = array<i64: 8, 32>}, {transform_indices = @transform_2, window_bounds = array<i64: 1, 16, 64>}, {transform_indices = @transform_3, window_bounds = array<i64: 1, 1, 64>}, {transform_indices = @transform_4, window_bounds = array<i64: 1, 1, 64>}, {transform_indices = @transform_5, window_bounds = array<i64: 1, 1, 64>}, {transform_indices = @transform_6, window_bounds = array<i64: 1, 64, 32>}, {transform_indices = @transform_7, window_bounds = array<i64: 1, 1, 32>}, {transform_indices = @transform_8, window_bounds = array<i64: 1, 1, 32>}, {transform_indices = @transform_9, window_bounds = array<i64: 1, 32, 64>}, {transform_indices = @transform_10, window_bounds = array<i64: 1, 1, 64>}, {transform_indices = @transform_11, window_bounds = array<i64: 1, 1, 64>}, {transform_indices = @transform_12, window_bounds = array<i64: 1, 1, 64>}, {transform_indices = @transform_13, window_bounds = array<i64: 1, 64, 32>}, {transform_indices = @transform_14, window_bounds = array<i64: 1, 1, 32>}, {transform_indices = @transform_15, window_bounds = array<i64: 1, 1, 32>}, {transform_indices = @transform_16, window_bounds = array<i64: 1, 1, 32>}, {transform_indices = @transform_17, window_bounds = array<i64: 1, 1, 32>}, {transform_indices = @transform_18, window_bounds = array<i64: 1, 1, 32>}, {transform_indices = @transform_19, window_bounds = array<i64: 1, 1, 32>}, {pipeline_mode = #tpu.pipeline_mode<synchronous>, transform_indices = @transform_20, window_bounds = array<i64: 8, 32>}]} {
    %c8_i32 = arith.constant 8 : i32
    %0 = arith.muli %arg1, %c8_i32 : i32
    %1 = tpu.assume_multiple %0, 8 : i32
    %c0_i32 = arith.constant 0 : i32
    %2 = arith.cmpi eq, %arg0, %c0_i32 : i32
    %c0_i32_0 = arith.constant 0 : i32
    %3 = arith.cmpi eq, %arg1, %c0_i32_0 : i32
    %4 = arith.andi %2, %3 : i1
    %5 = arith.extui %4 : i1 to i32
    %c0_i32_1 = arith.constant 0 : i32
    %6 = arith.cmpi ne, %5, %c0_i32_1 : i32
    scf.if %6 {
      %c0_83 = arith.constant 0 : index
      %c0_84 = arith.constant 0 : index
      %163 = vector.load %arg3[%c0_83, %c0_84] : memref<8x32xf32, #tpu.memory_space<vmem>>, vector<8x32xf32>
      %c0_85 = arith.constant 0 : index
      %c0_86 = arith.constant 0 : index
      %164 = vector.load %arg23[%c0_85, %c0_86] : memref<8x32xf32, #tpu.memory_space<vmem>>, vector<8x32xf32>
      tpu.vector_store %arg23[%c0_85, %c0_86], %163 {strides = array<i32>} : memref<8x32xf32, #tpu.memory_space<vmem>>, vector<8x32xf32>,
    } else {
    }
    %c0 = arith.constant 0 : index
    %c0_2 = arith.constant 0 : index
    %7 = vector.load %arg23[%c0, %c0_2] : memref<8x32xf32, #tpu.memory_space<vmem>>, vector<8x32xf32>
    %8 = arith.index_cast %1 : i32 to index
    %c0_3 = arith.constant 0 : index
    %9 = vector.load %arg23[%8, %c0_3] : memref<8x32xf32, #tpu.memory_space<vmem>>, vector<8x32xf32>
    %c0_4 = arith.constant 0 : index
    %c0_5 = arith.constant 0 : index
    %10 = vector.load %arg2[%c0_4, %c0_5] : memref<64x17xf32, #tpu.memory_space<vmem>>, vector<64x17xf32>
    %11 = vector.extract_strided_slice %10 {offsets = [0, 0], sizes = [64, 16], strides = [1, 1]} : vector<64x17xf32> to vector<64x16xf32>
    %12 = arith.truncf %11 : vector<64x16xf32> to vector<64x16xbf16>
    %13 = vector.extract_strided_slice %10 {offsets = [0, 16], sizes = [64, 1], strides = [1, 1]} : vector<64x17xf32> to vector<64x1xf32>
    %c0_6 = arith.constant 0 : index
    %c0_7 = arith.constant 0 : index
    %c0_8 = arith.constant 0 : index
    %14 = vector.load %arg4[%c0_6, %c0_7, %c0_8] : memref<1x16x64xbf16, #tpu.memory_space<vmem>>, vector<1x16x64xbf16>
    %15 = vector.shape_cast %14 : vector<1x16x64xbf16> to vector<16x64xbf16>
    %cst = arith.constant dense<0.000000e+00> : vector<64x64xf32>
    %16 = tpu.matmul %12, %15, %cst {dimension_numbers = #tpu.dot_dimension_numbers<[1], [0], [0], [1], [0, 0, 1, 1], [], []>} : vector<64x16xbf16>, vector<16x64xbf16>, vector<64x64xf32> -> vector<64x64xf32>
    %c0_9 = arith.constant 0 : index
    %c0_10 = arith.constant 0 : index
    %c0_11 = arith.constant 0 : index
    %17 = vector.load %arg5[%c0_9, %c0_10, %c0_11] : memref<1x1x64xf32, #tpu.memory_space<vmem>>, vector<1x1x64xf32>
    %18 = vector.shape_cast %17 : vector<1x1x64xf32> to vector<1x64xf32>
    %19 = vector.broadcast %18 : vector<1x64xf32> to vector<64x64xf32>
    %20 = arith.addf %16, %19 : vector<64x64xf32>
    %c0_12 = arith.constant 0 : index
    %c0_13 = arith.constant 0 : index
    %c0_14 = arith.constant 0 : index
    %21 = vector.load %arg6[%c0_12, %c0_13, %c0_14] : memref<1x1x64xf32, #tpu.memory_space<vmem>>, vector<1x1x64xf32>
    %22 = vector.shape_cast %21 : vector<1x1x64xf32> to vector<1x64xf32>
    %c0_15 = arith.constant 0 : index
    %c0_16 = arith.constant 0 : index
    %c0_17 = arith.constant 0 : index
    %23 = vector.load %arg7[%c0_15, %c0_16, %c0_17] : memref<1x1x64xf32, #tpu.memory_space<vmem>>, vector<1x1x64xf32>
    %24 = vector.shape_cast %23 : vector<1x1x64xf32> to vector<1x64xf32>
    %cst_18 = arith.constant dense<0.000000e+00> : vector<64xf32>
    %25 = vector.multi_reduction <add>, %20, %cst_18 [1] : vector<64x64xf32> to vector<64xf32>
    %26 = vector.shape_cast %25 : vector<64xf32> to vector<64x1xf32>
    %cst_19 = arith.constant 6.400000e+01 : f32
    %27 = vector.broadcast %cst_19 : f32 to vector<64x1xf32>
    %28 = arith.divf %26, %27 : vector<64x1xf32>
    %29 = vector.broadcast %28 : vector<64x1xf32> to vector<64x64xf32>
    %30 = arith.subf %20, %29 : vector<64x64xf32>
    %31 = arith.mulf %30, %30 : vector<64x64xf32>
    %cst_20 = arith.constant dense<0.000000e+00> : vector<64xf32>
    %32 = vector.multi_reduction <add>, %31, %cst_20 [1] : vector<64x64xf32> to vector<64xf32>
    %33 = vector.shape_cast %32 : vector<64xf32> to vector<64x1xf32>
    %cst_21 = arith.constant 6.400000e+01 : f32
    %34 = vector.broadcast %cst_21 : f32 to vector<64x1xf32>
    %35 = arith.divf %33, %34 : vector<64x1xf32>
    %cst_22 = arith.constant 9.99999974E-6 : f32
    %36 = vector.broadcast %cst_22 : f32 to vector<64x1xf32>
    %37 = arith.addf %35, %36 : vector<64x1xf32>
    %38 = math.rsqrt %37 : vector<64x1xf32>
    %39 = vector.broadcast %38 : vector<64x1xf32> to vector<64x64xf32>
    %40 = arith.mulf %30, %39 : vector<64x64xf32>
    %41 = vector.broadcast %22 : vector<1x64xf32> to vector<64x64xf32>
    %42 = arith.mulf %40, %41 : vector<64x64xf32>
    %43 = vector.broadcast %24 : vector<1x64xf32> to vector<64x64xf32>
    %44 = arith.addf %42, %43 : vector<64x64xf32>
    %45 = arith.negf %44 : vector<64x64xf32>
    %46 = math.exp %45 : vector<64x64xf32>
    %cst_23 = arith.constant 1.000000e+00 : f32
    %47 = vector.broadcast %cst_23 : f32 to vector<64x64xf32>
    %48 = arith.addf %47, %46 : vector<64x64xf32>
    %49 = arith.divf %47, %48 : vector<64x64xf32>
    %50 = arith.mulf %44, %49 : vector<64x64xf32>
    %51 = arith.truncf %50 : vector<64x64xf32> to vector<64x64xbf16>
    %c0_24 = arith.constant 0 : index
    %c0_25 = arith.constant 0 : index
    %c0_26 = arith.constant 0 : index
    %52 = vector.load %arg8[%c0_24, %c0_25, %c0_26] : memref<1x64x32xbf16, #tpu.memory_space<vmem>>, vector<1x64x32xbf16>
    %53 = vector.shape_cast %52 : vector<1x64x32xbf16> to vector<64x32xbf16>
    %cst_27 = arith.constant dense<0.000000e+00> : vector<64x32xf32>
    %54 = tpu.matmul %51, %53, %cst_27 {dimension_numbers = #tpu.dot_dimension_numbers<[1], [0], [0], [1], [0, 0, 1, 1], [], []>} : vector<64x64xbf16>, vector<64x32xbf16>, vector<64x32xf32> -> vector<64x32xf32>
    %c0_28 = arith.constant 0 : index
    %c0_29 = arith.constant 0 : index
    %c0_30 = arith.constant 0 : index
    %55 = vector.load %arg9[%c0_28, %c0_29, %c0_30] : memref<1x1x32xf32, #tpu.memory_space<vmem>>, vector<1x1x32xf32>
    %56 = vector.shape_cast %55 : vector<1x1x32xf32> to vector<1x32xf32>
    %57 = vector.broadcast %56 : vector<1x32xf32> to vector<64x32xf32>
    %58 = arith.addf %54, %57 : vector<64x32xf32>
    %59 = vector.broadcast %13 : vector<64x1xf32> to vector<64x32xf32>
    %60 = arith.mulf %58, %59 : vector<64x32xf32>
    %61 = vector.shape_cast %60 : vector<64x32xf32> to vector<8x8x32xf32>
    %62 = vector.shape_cast %7 : vector<8x32xf32> to vector<1x8x32xf32>
    %63 = vector.broadcast %62 : vector<1x8x32xf32> to vector<8x8x32xf32>
    %64 = arith.mulf %61, %63 : vector<8x8x32xf32>
    %cst_31 = arith.constant dense<0.000000e+00> : vector<8x32xf32>
    %65 = vector.multi_reduction <add>, %64, %cst_31 [1] : vector<8x8x32xf32> to vector<8x32xf32>
    %c0_32 = arith.constant 0 : index
    %c0_33 = arith.constant 0 : index
    %c0_34 = arith.constant 0 : index
    %66 = vector.load %arg10[%c0_32, %c0_33, %c0_34] : memref<1x1x32xf32, #tpu.memory_space<vmem>>, vector<1x1x32xf32>
    %67 = vector.shape_cast %66 : vector<1x1x32xf32> to vector<1x32xf32>
    %68 = vector.broadcast %67 : vector<1x32xf32> to vector<8x32xf32>
    %69 = arith.mulf %68, %65 : vector<8x32xf32>
    %70 = arith.addf %69, %9 : vector<8x32xf32>
    %71 = arith.truncf %70 : vector<8x32xf32> to vector<8x32xbf16>
    %c0_35 = arith.constant 0 : index
    %c0_36 = arith.constant 0 : index
    %c0_37 = arith.constant 0 : index
    %72 = vector.load %arg11[%c0_35, %c0_36, %c0_37] : memref<1x32x64xbf16, #tpu.memory_space<vmem>>, vector<1x32x64xbf16>
    %73 = vector.shape_cast %72 : vector<1x32x64xbf16> to vector<32x64xbf16>
    %cst_38 = arith.constant dense<0.000000e+00> : vector<8x64xf32>
    %74 = tpu.matmul %71, %73, %cst_38 {dimension_numbers = #tpu.dot_dimension_numbers<[1], [0], [0], [1], [0, 0, 1, 1], [], []>} : vector<8x32xbf16>, vector<32x64xbf16>, vector<8x64xf32> -> vector<8x64xf32>
    %c0_39 = arith.constant 0 : index
    %c0_40 = arith.constant 0 : index
    %c0_41 = arith.constant 0 : index
    %75 = vector.load %arg12[%c0_39, %c0_40, %c0_41] : memref<1x1x64xf32, #tpu.memory_space<vmem>>, vector<1x1x64xf32>
    %76 = vector.shape_cast %75 : vector<1x1x64xf32> to vector<1x64xf32>
    %77 = vector.broadcast %76 : vector<1x64xf32> to vector<8x64xf32>
    %78 = arith.addf %74, %77 : vector<8x64xf32>
    %c0_42 = arith.constant 0 : index
    %c0_43 = arith.constant 0 : index
    %c0_44 = arith.constant 0 : index
    %79 = vector.load %arg13[%c0_42, %c0_43, %c0_44] : memref<1x1x64xf32, #tpu.memory_space<vmem>>, vector<1x1x64xf32>
    %80 = vector.shape_cast %79 : vector<1x1x64xf32> to vector<1x64xf32>
    %c0_45 = arith.constant 0 : index
    %c0_46 = arith.constant 0 : index
    %c0_47 = arith.constant 0 : index
    %81 = vector.load %arg14[%c0_45, %c0_46, %c0_47] : memref<1x1x64xf32, #tpu.memory_space<vmem>>, vector<1x1x64xf32>
    %82 = vector.shape_cast %81 : vector<1x1x64xf32> to vector<1x64xf32>
    %cst_48 = arith.constant dense<0.000000e+00> : vector<8xf32>
    %83 = vector.multi_reduction <add>, %78, %cst_48 [1] : vector<8x64xf32> to vector<8xf32>
    %84 = vector.shape_cast %83 : vector<8xf32> to vector<8x1xf32>
    %cst_49 = arith.constant 6.400000e+01 : f32
    %85 = vector.broadcast %cst_49 : f32 to vector<8x1xf32>
    %86 = arith.divf %84, %85 : vector<8x1xf32>
    %87 = vector.broadcast %86 : vector<8x1xf32> to vector<8x64xf32>
    %88 = arith.subf %78, %87 : vector<8x64xf32>
    %89 = arith.mulf %88, %88 : vector<8x64xf32>
    %cst_50 = arith.constant dense<0.000000e+00> : vector<8xf32>
    %90 = vector.multi_reduction <add>, %89, %cst_50 [1] : vector<8x64xf32> to vector<8xf32>
    %91 = vector.shape_cast %90 : vector<8xf32> to vector<8x1xf32>
    %cst_51 = arith.constant 6.400000e+01 : f32
    %92 = vector.broadcast %cst_51 : f32 to vector<8x1xf32>
    %93 = arith.divf %91, %92 : vector<8x1xf32>
    %cst_52 = arith.constant 9.99999974E-6 : f32
    %94 = vector.broadcast %cst_52 : f32 to vector<8x1xf32>
    %95 = arith.addf %93, %94 : vector<8x1xf32>
    %96 = math.rsqrt %95 : vector<8x1xf32>
    %97 = vector.broadcast %96 : vector<8x1xf32> to vector<8x64xf32>
    %98 = arith.mulf %88, %97 : vector<8x64xf32>
    %99 = vector.broadcast %80 : vector<1x64xf32> to vector<8x64xf32>
    %100 = arith.mulf %98, %99 : vector<8x64xf32>
    %101 = vector.broadcast %82 : vector<1x64xf32> to vector<8x64xf32>
    %102 = arith.addf %100, %101 : vector<8x64xf32>
    %103 = arith.negf %102 : vector<8x64xf32>
    %104 = math.exp %103 : vector<8x64xf32>
    %cst_53 = arith.constant 1.000000e+00 : f32
    %105 = vector.broadcast %cst_53 : f32 to vector<8x64xf32>
    %106 = arith.addf %105, %104 : vector<8x64xf32>
    %107 = arith.divf %105, %106 : vector<8x64xf32>
    %108 = arith.mulf %102, %107 : vector<8x64xf32>
    %109 = arith.truncf %108 : vector<8x64xf32> to vector<8x64xbf16>
    %c0_54 = arith.constant 0 : index
    %c0_55 = arith.constant 0 : index
    %c0_56 = arith.constant 0 : index
    %110 = vector.load %arg15[%c0_54, %c0_55, %c0_56] : memref<1x64x32xbf16, #tpu.memory_space<vmem>>, vector<1x64x32xbf16>
    %111 = vector.shape_cast %110 : vector<1x64x32xbf16> to vector<64x32xbf16>
    %cst_57 = arith.constant dense<0.000000e+00> : vector<8x32xf32>
    %112 = tpu.matmul %109, %111, %cst_57 {dimension_numbers = #tpu.dot_dimension_numbers<[1], [0], [0], [1], [0, 0, 1, 1], [], []>} : vector<8x64xbf16>, vector<64x32xbf16>, vector<8x32xf32> -> vector<8x32xf32>
    %c0_58 = arith.constant 0 : index
    %c0_59 = arith.constant 0 : index
    %c0_60 = arith.constant 0 : index
    %113 = vector.load %arg16[%c0_58, %c0_59, %c0_60] : memref<1x1x32xf32, #tpu.memory_space<vmem>>, vector<1x1x32xf32>
    %114 = vector.shape_cast %113 : vector<1x1x32xf32> to vector<1x32xf32>
    %115 = vector.broadcast %114 : vector<1x32xf32> to vector<8x32xf32>
    %116 = arith.addf %112, %115 : vector<8x32xf32>
    %c1_i32 = arith.constant 1 : i32
    %117 = arith.cmpi slt, %arg0, %c1_i32 : i32
    %c0_61 = arith.constant 0 : index
    %c0_62 = arith.constant 0 : index
    %c0_63 = arith.constant 0 : index
    %118 = vector.load %arg17[%c0_61, %c0_62, %c0_63] : memref<1x1x32xf32, #tpu.memory_space<vmem>>, vector<1x1x32xf32>
    %119 = vector.shape_cast %118 : vector<1x1x32xf32> to vector<1x32xf32>
    %c0_64 = arith.constant 0 : index
    %c0_65 = arith.constant 0 : index
    %c0_66 = arith.constant 0 : index
    %120 = vector.load %arg18[%c0_64, %c0_65, %c0_66] : memref<1x1x32xf32, #tpu.memory_space<vmem>>, vector<1x1x32xf32>
    %121 = vector.shape_cast %120 : vector<1x1x32xf32> to vector<1x32xf32>
    %cst_67 = arith.constant dense<0.000000e+00> : vector<8xf32>
    %122 = vector.multi_reduction <add>, %116, %cst_67 [1] : vector<8x32xf32> to vector<8xf32>
    %123 = vector.shape_cast %122 : vector<8xf32> to vector<8x1xf32>
    %cst_68 = arith.constant 3.200000e+01 : f32
    %124 = vector.broadcast %cst_68 : f32 to vector<8x1xf32>
    %125 = arith.divf %123, %124 : vector<8x1xf32>
    %126 = vector.broadcast %125 : vector<8x1xf32> to vector<8x32xf32>
    %127 = arith.subf %116, %126 : vector<8x32xf32>
    %128 = arith.mulf %127, %127 : vector<8x32xf32>
    %cst_69 = arith.constant dense<0.000000e+00> : vector<8xf32>
    %129 = vector.multi_reduction <add>, %128, %cst_69 [1] : vector<8x32xf32> to vector<8xf32>
    %130 = vector.shape_cast %129 : vector<8xf32> to vector<8x1xf32>
    %cst_70 = arith.constant 3.200000e+01 : f32
    %131 = vector.broadcast %cst_70 : f32 to vector<8x1xf32>
    %132 = arith.divf %130, %131 : vector<8x1xf32>
    %cst_71 = arith.constant 9.99999974E-6 : f32
    %133 = vector.broadcast %cst_71 : f32 to vector<8x1xf32>
    %134 = arith.addf %132, %133 : vector<8x1xf32>
    %135 = math.rsqrt %134 : vector<8x1xf32>
    %136 = vector.broadcast %135 : vector<8x1xf32> to vector<8x32xf32>
    %137 = arith.mulf %127, %136 : vector<8x32xf32>
    %138 = vector.broadcast %119 : vector<1x32xf32> to vector<8x32xf32>
    %139 = arith.mulf %137, %138 : vector<8x32xf32>
    %140 = vector.broadcast %121 : vector<1x32xf32> to vector<8x32xf32>
    %141 = arith.addf %139, %140 : vector<8x32xf32>
    %142 = arith.negf %141 : vector<8x32xf32>
    %143 = math.exp %142 : vector<8x32xf32>
    %cst_72 = arith.constant 1.000000e+00 : f32
    %144 = vector.broadcast %cst_72 : f32 to vector<8x32xf32>
    %145 = arith.addf %144, %143 : vector<8x32xf32>
    %146 = arith.divf %144, %145 : vector<8x32xf32>
    %147 = arith.mulf %141, %146 : vector<8x32xf32>
    %148 = arith.select %117, %147, %116 : vector<8x32xf32>
    %149 = arith.index_cast %1 : i32 to index
    %c0_73 = arith.constant 0 : index
    %150 = vector.load %arg24[%149, %c0_73] : memref<8x32xf32, #tpu.memory_space<vmem>>, vector<8x32xf32>
    tpu.vector_store %arg24[%149, %c0_73], %148 {strides = array<i32>} : memref<8x32xf32, #tpu.memory_space<vmem>>, vector<8x32xf32>,
    %c1_i32_74 = arith.constant 1 : i32
    %151 = arith.cmpi eq, %arg0, %c1_i32_74 : i32
    %cst_75 = arith.constant 8.000000e-01 : f32
    %cst_76 = arith.constant 8.000000e-01 : f32
    %152 = arith.select %151, %cst_75, %cst_76 : f32
    %c0_i32_77 = arith.constant 0 : i32
    %153 = arith.cmpi eq, %arg1, %c0_i32_77 : i32
    %c1_i32_78 = arith.constant 1 : i32
    %154 = arith.cmpi slt, %arg0, %c1_i32_78 : i32
    %155 = arith.andi %153, %154 : i1
    %156 = arith.extui %155 : i1 to i32
    %c0_i32_79 = arith.constant 0 : i32
    %157 = arith.cmpi ne, %156, %c0_i32_79 : i32
    scf.if %157 {
      %c0_83 = arith.constant 0 : index
      %c0_84 = arith.constant 0 : index
      %163 = vector.load %arg24[%c0_83, %c0_84] : memref<8x32xf32, #tpu.memory_space<vmem>>, vector<8x32xf32>
      %164 = tpu.iota {dimensions = array<i32: 0>} : vector<8x1xi32>
      %c8_i32_85 = arith.constant 8 : i32
      %165 = vector.broadcast %c8_i32_85 : i32 to vector<8x1xi32>
      %166 = arith.cmpi slt, %164, %165 : vector<8x1xi32>
      %167 = arith.extui %166 : vector<8x1xi1> to vector<8x1xi32>
      %168 = arith.sitofp %167 : vector<8x1xi32> to vector<8x1xf32>
      %169 = vector.broadcast %168 : vector<8x1xf32> to vector<8x32xf32>
      %170 = arith.mulf %163, %169 : vector<8x32xf32>
      %cst_86 = arith.constant dense<0.000000e+00> : vector<32xf32>
      %171 = vector.multi_reduction <add>, %170, %cst_86 [0] : vector<8x32xf32> to vector<32xf32>
      %172 = vector.shape_cast %171 : vector<32xf32> to vector<1x32xf32>
      %cst_87 = arith.constant 1.250000e-01 : f32
      %173 = vector.broadcast %cst_87 : f32 to vector<1x32xf32>
      %174 = arith.mulf %172, %173 : vector<1x32xf32>
      %c0_88 = arith.constant 0 : index
      %c0_89 = arith.constant 0 : index
      %c0_90 = arith.constant 0 : index
      %175 = vector.load %arg21[%c0_88, %c0_89, %c0_90] : memref<1x1x32xf32, #tpu.memory_space<vmem>>, vector<1x1x32xf32>
      %176 = vector.shape_cast %175 : vector<1x1x32xf32> to vector<1x32xf32>
      %177 = arith.mulf %174, %176 : vector<1x32xf32>
      %178 = vector.broadcast %177 : vector<1x32xf32> to vector<8x32xf32>
      %179 = arith.subf %163, %178 : vector<8x32xf32>
      %180 = arith.mulf %179, %179 : vector<8x32xf32>
      %181 = vector.broadcast %168 : vector<8x1xf32> to vector<8x32xf32>
      %182 = arith.mulf %180, %181 : vector<8x32xf32>
      %cst_91 = arith.constant dense<0.000000e+00> : vector<32xf32>
      %183 = vector.multi_reduction <add>, %182, %cst_91 [0] : vector<8x32xf32> to vector<32xf32>
      %184 = vector.shape_cast %183 : vector<32xf32> to vector<1x32xf32>
      %cst_92 = arith.constant 1.250000e-01 : f32
      %185 = vector.broadcast %cst_92 : f32 to vector<1x32xf32>
      %186 = arith.mulf %184, %185 : vector<1x32xf32>
      %c0_93 = arith.constant 0 : index
      %c0_94 = arith.constant 0 : index
      %c0_95 = arith.constant 0 : index
      %187 = vector.load %arg19[%c0_93, %c0_94, %c0_95] : memref<1x1x32xf32, #tpu.memory_space<vmem>>, vector<1x1x32xf32>
      %188 = vector.shape_cast %187 : vector<1x1x32xf32> to vector<1x32xf32>
      %189 = vector.broadcast %188 : vector<1x32xf32> to vector<8x32xf32>
      %190 = arith.mulf %189, %179 : vector<8x32xf32>
      %cst_96 = arith.constant 9.99999974E-6 : f32
      %191 = vector.broadcast %cst_96 : f32 to vector<1x32xf32>
      %192 = arith.addf %186, %191 : vector<1x32xf32>
      %193 = math.rsqrt %192 : vector<1x32xf32>
      %194 = vector.broadcast %193 : vector<1x32xf32> to vector<8x32xf32>
      %195 = arith.mulf %190, %194 : vector<8x32xf32>
      %c0_97 = arith.constant 0 : index
      %c0_98 = arith.constant 0 : index
      %c0_99 = arith.constant 0 : index
      %196 = vector.load %arg20[%c0_97, %c0_98, %c0_99] : memref<1x1x32xf32, #tpu.memory_space<vmem>>, vector<1x1x32xf32>
      %197 = vector.shape_cast %196 : vector<1x1x32xf32> to vector<1x32xf32>
      %198 = vector.broadcast %197 : vector<1x32xf32> to vector<8x32xf32>
      %199 = arith.addf %195, %198 : vector<8x32xf32>
      %200 = arith.negf %199 : vector<8x32xf32>
      %201 = math.exp %200 : vector<8x32xf32>
      %cst_100 = arith.constant 1.000000e+00 : f32
      %202 = vector.broadcast %cst_100 : f32 to vector<8x32xf32>
      %203 = arith.addf %202, %201 : vector<8x32xf32>
      %204 = arith.divf %202, %203 : vector<8x32xf32>
      %205 = arith.mulf %199, %204 : vector<8x32xf32>
      %c0_101 = arith.constant 0 : index
      %c0_102 = arith.constant 0 : index
      %206 = vector.load %arg23[%c0_101, %c0_102] : memref<8x32xf32, #tpu.memory_space<vmem>>, vector<8x32xf32>
      %207 = vector.broadcast %152 : f32 to vector<8x32xf32>
      %208 = arith.mulf %207, %205 : vector<8x32xf32>
      %209 = arith.addf %206, %208 : vector<8x32xf32>
      %c0_103 = arith.constant 0 : index
      %c0_104 = arith.constant 0 : index
      %210 = vector.load %arg23[%c0_103, %c0_104] : memref<8x32xf32, #tpu.memory_space<vmem>>, vector<8x32xf32>
      tpu.vector_store %arg23[%c0_103, %c0_104], %209 {strides = array<i32>} : memref<8x32xf32, #tpu.memory_space<vmem>>, vector<8x32xf32>,
    } else {
    }
    %c0_i32_80 = arith.constant 0 : i32
    %158 = arith.cmpi eq, %arg1, %c0_i32_80 : i32
    %c1_i32_81 = arith.constant 1 : i32
    %159 = arith.cmpi eq, %arg0, %c1_i32_81 : i32
    %160 = arith.andi %158, %159 : i1
    %161 = arith.extui %160 : i1 to i32
    %c0_i32_82 = arith.constant 0 : i32
    %162 = arith.cmpi ne, %161, %c0_i32_82 : i32
    scf.if %162 {
      %c0_83 = arith.constant 0 : index
      %c0_84 = arith.constant 0 : index
      %163 = vector.load %arg23[%c0_83, %c0_84] : memref<8x32xf32, #tpu.memory_space<vmem>>, vector<8x32xf32>
      %c0_85 = arith.constant 0 : index
      %c0_86 = arith.constant 0 : index
      %164 = vector.load %arg24[%c0_85, %c0_86] : memref<8x32xf32, #tpu.memory_space<vmem>>, vector<8x32xf32>
      %165 = vector.broadcast %152 : f32 to vector<8x32xf32>
      %166 = arith.mulf %165, %164 : vector<8x32xf32>
      %167 = arith.addf %163, %166 : vector<8x32xf32>
      %c0_87 = arith.constant 0 : index
      %c0_88 = arith.constant 0 : index
      %168 = vector.load %arg22[%c0_87, %c0_88] : memref<8x32xf32, #tpu.memory_space<vmem>>, vector<8x32xf32>
      tpu.vector_store %arg22[%c0_87, %c0_88], %167 {strides = array<i32>} : memref<8x32xf32, #tpu.memory_space<vmem>>, vector<8x32xf32>,
    } else {
    }
    return
  }
  func.func @transform_0(%arg0: i32, %arg1: i32) -> (i32, i32) {
    %c0_i32 = arith.constant 0 : i32
    %c0_i32_0 = arith.constant 0 : i32
    return %arg1, %c0_i32 : i32, i32
  }
  func.func @transform_1(%arg0: i32, %arg1: i32) -> (i32, i32) {
    %c0_i32 = arith.constant 0 : i32
    %c0_i32_0 = arith.constant 0 : i32
    %c0_i32_1 = arith.constant 0 : i32
    return %c0_i32, %c0_i32_0 : i32, i32
  }
  func.func @transform_2(%arg0: i32, %arg1: i32) -> (i32, i32, i32) {
    %c0_i32 = arith.constant 0 : i32
    %c0_i32_0 = arith.constant 0 : i32
    %c0_i32_1 = arith.constant 0 : i32
    return %arg0, %c0_i32, %c0_i32_0 : i32, i32, i32
  }
  func.func @transform_3(%arg0: i32, %arg1: i32) -> (i32, i32, i32) {
    %c0_i32 = arith.constant 0 : i32
    %c0_i32_0 = arith.constant 0 : i32
    %c0_i32_1 = arith.constant 0 : i32
    return %arg0, %c0_i32, %c0_i32_0 : i32, i32, i32
  }
  func.func @transform_4(%arg0: i32, %arg1: i32) -> (i32, i32, i32) {
    %c0_i32 = arith.constant 0 : i32
    %c0_i32_0 = arith.constant 0 : i32
    %c0_i32_1 = arith.constant 0 : i32
    return %arg0, %c0_i32, %c0_i32_0 : i32, i32, i32
  }
  func.func @transform_5(%arg0: i32, %arg1: i32) -> (i32, i32, i32) {
    %c0_i32 = arith.constant 0 : i32
    %c0_i32_0 = arith.constant 0 : i32
    %c0_i32_1 = arith.constant 0 : i32
    return %arg0, %c0_i32, %c0_i32_0 : i32, i32, i32
  }
  func.func @transform_6(%arg0: i32, %arg1: i32) -> (i32, i32, i32) {
    %c0_i32 = arith.constant 0 : i32
    %c0_i32_0 = arith.constant 0 : i32
    %c0_i32_1 = arith.constant 0 : i32
    return %arg0, %c0_i32, %c0_i32_0 : i32, i32, i32
  }
  func.func @transform_7(%arg0: i32, %arg1: i32) -> (i32, i32, i32) {
    %c0_i32 = arith.constant 0 : i32
    %c0_i32_0 = arith.constant 0 : i32
    %c0_i32_1 = arith.constant 0 : i32
    return %arg0, %c0_i32, %c0_i32_0 : i32, i32, i32
  }
  func.func @transform_8(%arg0: i32, %arg1: i32) -> (i32, i32, i32) {
    %c0_i32 = arith.constant 0 : i32
    %c0_i32_0 = arith.constant 0 : i32
    %c0_i32_1 = arith.constant 0 : i32
    return %arg0, %c0_i32, %c0_i32_0 : i32, i32, i32
  }
  func.func @transform_9(%arg0: i32, %arg1: i32) -> (i32, i32, i32) {
    %c0_i32 = arith.constant 0 : i32
    %c0_i32_0 = arith.constant 0 : i32
    %c0_i32_1 = arith.constant 0 : i32
    return %arg0, %c0_i32, %c0_i32_0 : i32, i32, i32
  }
  func.func @transform_10(%arg0: i32, %arg1: i32) -> (i32, i32, i32) {
    %c0_i32 = arith.constant 0 : i32
    %c0_i32_0 = arith.constant 0 : i32
    %c0_i32_1 = arith.constant 0 : i32
    return %arg0, %c0_i32, %c0_i32_0 : i32, i32, i32
  }
  func.func @transform_11(%arg0: i32, %arg1: i32) -> (i32, i32, i32) {
    %c0_i32 = arith.constant 0 : i32
    %c0_i32_0 = arith.constant 0 : i32
    %c0_i32_1 = arith.constant 0 : i32
    return %arg0, %c0_i32, %c0_i32_0 : i32, i32, i32
  }
  func.func @transform_12(%arg0: i32, %arg1: i32) -> (i32, i32, i32) {
    %c0_i32 = arith.constant 0 : i32
    %c0_i32_0 = arith.constant 0 : i32
    %c0_i32_1 = arith.constant 0 : i32
    return %arg0, %c0_i32, %c0_i32_0 : i32, i32, i32
  }
  func.func @transform_13(%arg0: i32, %arg1: i32) -> (i32, i32, i32) {
    %c0_i32 = arith.constant 0 : i32
    %c0_i32_0 = arith.constant 0 : i32
    %c0_i32_1 = arith.constant 0 : i32
    return %arg0, %c0_i32, %c0_i32_0 : i32, i32, i32
  }
  func.func @transform_14(%arg0: i32, %arg1: i32) -> (i32, i32, i32) {
    %c0_i32 = arith.constant 0 : i32
    %c0_i32_0 = arith.constant 0 : i32
    %c0_i32_1 = arith.constant 0 : i32
    return %arg0, %c0_i32, %c0_i32_0 : i32, i32, i32
  }
  func.func @transform_15(%arg0: i32, %arg1: i32) -> (i32, i32, i32) {
    %c0_i32 = arith.constant 0 : i32
    %c0_i32_0 = arith.constant 0 : i32
    %c0_i32_1 = arith.constant 0 : i32
    return %arg0, %c0_i32, %c0_i32_0 : i32, i32, i32
  }
  func.func @transform_16(%arg0: i32, %arg1: i32) -> (i32, i32, i32) {
    %c0_i32 = arith.constant 0 : i32
    %c0_i32_0 = arith.constant 0 : i32
    %c0_i32_1 = arith.constant 0 : i32
    return %arg0, %c0_i32, %c0_i32_0 : i32, i32, i32
  }
  func.func @transform_17(%arg0: i32, %arg1: i32) -> (i32, i32, i32) {
    %c0_i32 = arith.constant 0 : i32
    %c0_i32_0 = arith.constant 0 : i32
    %c0_i32_1 = arith.constant 0 : i32
    return %arg0, %c0_i32, %c0_i32_0 : i32, i32, i32
  }
  func.func @transform_18(%arg0: i32, %arg1: i32) -> (i32, i32, i32) {
    %c0_i32 = arith.constant 0 : i32
    %c0_i32_0 = arith.constant 0 : i32
    %c0_i32_1 = arith.constant 0 : i32
    return %arg0, %c0_i32, %c0_i32_0 : i32, i32, i32
  }
  func.func @transform_19(%arg0: i32, %arg1: i32) -> (i32, i32, i32) {
    %c0_i32 = arith.constant 0 : i32
    %c0_i32_0 = arith.constant 0 : i32
    %c0_i32_1 = arith.constant 0 : i32
    return %arg0, %c0_i32, %c0_i32_0 : i32, i32, i32
  }
  func.func @transform_20(%arg0: i32, %arg1: i32) -> (i32, i32) {
    %c0_i32 = arith.constant 0 : i32
    %c0_i32_0 = arith.constant 0 : i32
    %c0_i32_1 = arith.constant 0 : i32
    return %c0_i32, %c0_i32_0 : i32, i32
  }
}

</mosaic_0001>

<bundles_post_ra>
// kernel: gpgin_forward.1
= control target key start
LH: loop header
LB: loop body
LE: loop exit
PB: predicated region body
PF: predicated region fallthrough
CT: control target
= control target key end

     0   :  { %s2382_s22 = smov 0   ;;  %s2384_s23 = smov 0   ;;  %s2752_s0 = inlined_call_operand.vmem [shape: f32[64,17], index: 0, kind: input, shape index: {}]   ;;  %s2753_s1 = inlined_call_operand.vmem [shape: f32[8,32], index: 1, kind: input, shape index: {}]   ;;  %s2754_s2 = inlined_call_operand.vmem [shape: bf16[2,16,64], index: 2, kind: input, shape index: {}]   ;;  %s2755_s3 = inlined_call_operand.vmem [shape: f32[2,1,64], index: 3, kind: input, shape index: {}]   ;;  %s2756_s4 = inlined_call_operand.vmem [shape: f32[2,1,64], index: 4, kind: input, shape index: {}]   ;;  %s2757_s5 = inlined_call_operand.vmem [shape: f32[2,1,64], index: 5, kind: input, shape index: {}]   ;;  %s2758_s6 = inlined_call_operand.vmem [shape: bf16[2,64,32], index: 6, kind: input, shape index: {}]   ;;  %s2759_s7 = inlined_call_operand.vmem [shape: f32[2,1,32], index: 7, kind: input, shape index: {}]   ;;  %s2760_s8 = inlined_call_operand.vmem [shape: f32[2,1,32], index: 8, kind: input, shape index: {}]   ;;  %s2761_s9 = inlined_call_operand.vmem [shape: bf16[2,32,64], index: 9, kind: input, shape index: {}]   ;;  %s2762_s10 = inlined_call_operand.vmem [shape: f32[2,1,64], index: 10, kind: input, shape index: {}]   ;;  %s2763_s11 = inlined_call_operand.vmem [shape: f32[2,1,64], index: 11, kind: input, shape index: {}]   ;;  %s2764_s12 = inlined_call_operand.vmem [shape: f32[2,1,64], index: 12, kind: input, shape index: {}]   ;;  %s2765_s13 = inlined_call_operand.vmem [shape: bf16[2,64,32], index: 13, kind: input, shape index: {}]   ;;  %s2766_s14 = inlined_call_operand.vmem [shape: f32[2,1,32], index: 14, kind: input, shape index: {}]   ;;  %s2767_s15 = inlined_call_operand.vmem [shape: f32[2,1,32], index: 15, kind: input, shape index: {}]   ;;  %s2768_s16 = inlined_call_operand.vmem [shape: f32[2,1,32], index: 16, kind: input, shape index: {}]   ;;  %s2769_s17 = inlined_call_operand.vmem [shape: f32[2,1,32], index: 17, kind: input, shape index: {}]   ;;  %s2770_s18 = inlined_call_operand.vmem [shape: f32[2,1,32], index: 18, kind: input, shape index: {}]   ;;  %s2771_s19 = inlined_call_operand.vmem [shape: f32[2,1,32], index: 19, kind: input, shape index: {}]   ;;  %s2772_s20 = inlined_call_operand.vmem [shape: f32[8,32], index: 20, kind: output, shape index: {}]  }
   0x1   :  { %2778 = sst [smem:[#allocation8_spill]] %s2752_s0 }
   0x2   :  { %2779 = sst [smem:[#allocation9_spill]] %s2753_s1  ;;  %s2380_s1 = smov 0  }
   0x3   :  { %2780 = sst [smem:[#allocation10_spill]] %s2754_s2 }
   0x4   :  { %2781 = sst [smem:[#allocation11_spill]] %s2755_s3 }
   0x5   :  { %2782 = sst [smem:[#allocation12_spill]] %s2756_s4 }
   0x6   :  { %2783 = sst [smem:[#allocation13_spill]] %s2757_s5 }
   0x7   :  { %2784 = sst [smem:[#allocation14_spill]] %s2758_s6 }
   0x8   :  { %2785 = sst [smem:[#allocation15_spill]] %s2761_s9 }
   0x9   :  { %2786 = sst [smem:[#allocation16_spill]] %s2764_s12 }
   0xa   :  { %2787 = sst [smem:[#allocation17_spill]] %s2765_s13 }
   0xb   :  { %2788 = sst [smem:[#allocation18_spill]] %s2770_s18 }
   0xc   :  { %2789 = sst [smem:[#allocation19_spill]] %s2771_s19 }
   0xd   :  { %2790 = sst [smem:[#allocation20_spill]] %s2772_s20 }
   0xe LB: > { %2791 = sst [smem:[#allocation4_spill]] %s2262_s1  ;;  %s42_s24 = sadd.s32 1, %s2266_s22  ;;  %s2270_s23 = sphi %s2384_s23, %s30_s23   ;;  %s2266_s22 = sphi %s2382_s22, %s2829_s22   ;;  %s2262_s1 = sphi %s2380_s1, %s2828_s1  }
   0xf   : > { %2792 = sst [smem:[#allocation5_spill]] %s2266_s22  ;;  %p2009_p0 = scmp.ge.s32.totalorder %s2270_s23, 1 }
  0x10   : > { %2793 = sst [smem:[#allocation6_spill]] %s2270_s23  ;;  %p44_p1 = scmp.ge.s32.totalorder %s42_s24, 2 }
  0x11   : > { %p722_p2 = scmp.lt.s32.totalorder %s2270_s23, 3 }
  0x12   : > { %s2831_s24 = smov (%p44_p1, %s42_s24), 0 }
  0x13   : > { %2794 = sst [smem:[#allocation7_spill]] %s2831_s24  ;;  %p723_p3 = pnand %p2009_p0, %p722_p2 }
  0x14   : > { %p843_p4 = scmp.lt.s32.totalorder (!%p723_p3), %s2262_s1, 1  ;;  %p907_p5 = scmp.eq.s32.totalorder (!%p723_p3), %s2262_s1, 0 }
  0x15   : > { %726 = sbr.rel (%p723_p3) target bundleno = 2095 (0x82f), region = 100  ;;  %s2796_s30 = sld [smem:[#allocation10_spill]] (!%p723_p3) }
  0x16   : > { %s2799_s6 = sld [smem:[#allocation14_spill]] (!%p723_p3)  ;;  %s2800_s9 = sld [smem:[#allocation15_spill]] (!%p723_p3) }
  0x17   : > { %s2802_s13 = sld [smem:[#allocation17_spill]] (!%p723_p3)  ;;  %s2804_s23 = sld [smem:[#allocation19_spill]] (!%p723_p3) }
  0x1c   : > { %s2405_s2 = scalar_select %p843_p4, %s2262_s1, 1 }
  0x1d   : > { %s2806_s28 = sld [smem:[#allocation9_spill]] (%p907_p5)  ;;  %vm914_vm0 = vcmask (%p907_p5), 261120  }
  0x1e   : > { %s2068_s25 = sshll.u32 %s2405_s2, 3  ;;  %s2069_s18 = sshll.u32 %s2405_s2, 5 }
  0x1f   : > { %s847_s0 = scalar_lea.vmem %s2796_s30, %s2068_s25  ;;  %s2427_s27 = scalar_lea.vmem %s2799_s6, %s2069_s18 }
  0x20   : > { %s2070_s21 = sshll.u32 %s2405_s2, 4  ;;  %s2458_s22 = scalar_lea.vmem %s2802_s13, %s2069_s18 }
  0x21   : > { %s2441_s1 = scalar_lea.vmem %s2800_s9, %s2070_s21  ;;  %s895_s26 = scalar_lea.vmem %s2768_s16, %s2405_s2 }
  0x22   : > { %s898_s29 = scalar_lea.vmem %s2769_s17, %s2405_s2  ;;  %s2803_s18 = sld [smem:[#allocation18_spill]] }
  0x23   : > { %s904_s21 = scalar_lea.vmem %s2804_s23, %s2405_s2  ;;  %912 = sbr.rel (!%p907_p5) target bundleno = 42 (0x2a), region = 104  ;;  %v913_v0 = vld [vmem:[%s2806_s28] sm:$0xff] (%p907_p5) }
  0x24   : > { %915 = vst.msk [vmem:[#allocation2] sm:$0xff] (%p907_p5), %vm914_vm0, %v913_v0 }
  0x28   : > { %s901_s24 = scalar_lea.vmem %s2803_s18, %s2405_s2 }
  0x2a PF: > { %v2171_v1 = vld [vmem:[%s847_s0] sm:$0xff]   ;;  %s2807_s6 = sld [smem:[#allocation8_spill]]  ;;  %vm946_vm1 = vcmask 130048   ;;  %s2808_s12 = sld [smem:[#allocation11_spill]]  ;;  %vm1026_vm2 = vcmask 523264   ;;  %vm2274_vm3 = vmmov 0  }
  0x2b   : > { %2096 = vmatprep.subr.bf16.mxu0 %v2171_v1  ;;  %s2810_s20 = sld [smem:[#allocation12_spill]]  ;;  %s2812_s23 = sld [smem:[#allocation13_spill]]  ;;  %vm1392_vm4 = vcmask 261120   ;;  %vm1464_vm5 = vcmask 1041409   ;;  %vm1466_vm6 = vcmask 1042434   ;;  %vm1468_vm7 = vcmask 1043459  }
  0x2c   : > { %2097 = vmatpush3.bf16.msra.mxu0 %v2171_v1  ;;  %s2814_s3 = scalar_lea.vmem %s2759_s7, %s2405_s2  ;;  %vm1470_vm8 = vcmask 1044484   ;;  %vm1472_vm9 = vcmask 1045509   ;;  %vm1474_vm10 = vcmask 1046534   ;;  %vm1476_vm11 = vcmask 1047559   ;;  %s2815_s4 = scalar_lea.vmem %s2760_s8, %s2405_s2 }
  0x2d   : > { %s2820_s5 = scalar_lea.vmem %s2766_s14, %s2405_s2 }
  0x30   : > { %v2492_v2 = vld [vmem:[%s2807_s6] sm:$0xff]  ;;  %v2497_v3 = vld [vmem:[%s2807_s6 + $0x8] sm:$0xff]  ;;  %v2502_v4 = vld [vmem:[%s2807_s6 + $0x10] sm:$0xff]  ;;  %s2809_s13 = scalar_lea.vmem %s2808_s12, %s2405_s2 }
  0x31   : > { %v927_v5 = vpack.c.bf16 %v2497_v3, %v2492_v2  ;;  %v2509_v6 = vld [vmem:[%s2807_s6 + $0x18] sm:$0xff]  ;;  %v2514_v7 = vld [vmem:[%s2807_s6 + $0x20] sm:$0xff]  ;;  %v2519_v8 = vld [vmem:[%s2807_s6 + $0x28] sm:$0xff]  ;;  %s2811_s28 = scalar_lea.vmem %s2810_s20, %s2405_s2  ;;  %s2813_s9 = scalar_lea.vmem %s2812_s23, %s2405_s2 }
  0x32   : > { %v928_v9 = vpack.c.bf16 %v2509_v6, %v2502_v4  ;;  %v929_v10 = vpack.c.bf16 %v2519_v8, %v2514_v7  ;;  %v2529_v11 = vld [vmem:[%s2807_s6 + $0x30] sm:$0xff]  ;;  %v2534_v12 = vld [vmem:[%s2807_s6 + $0x38] sm:$0xff]  ;;  %v2019_v14 = vld [vmem:[%s2809_s13] ss:$0 sm:$0xff]  ;;  %s2818_s23 = sld [smem:[#allocation16_spill]] }
  0x33   : > { %2098 = vmatprep.mubr.msk.bf16.mxu0 %vm946_vm1, %v927_v5  ;;  %v930_v13 = vpack.c.bf16 %v2534_v12, %v2529_v11 }
  0x34   : > { %2099 = vmatmul.mubr.msk.bf16.vlgmr.msra.gmra.mrb[0].mxu0 %vm946_vm1, %v928_v9 }
  0x35   : > { %2102 = vmatprep.mubr.msk.bf16.mxu0 %vm946_vm1, %v929_v10 }
  0x3c   : > { %2103 = vmatmul.mubr.msk.bf16.gmra.mrb[4].mxu0 %vm946_vm1, %v930_v13 }
 0x107   : > { %v2100_v15 = vpop.f32.mrb[0].mxu0 }
 0x108   : > { %v1002_v16 = vadd.f32 %v2100_v15, %v2019_v14  ;;  %v993_v17 = vpop.f32.mrb[1].mxu0 }
 0x109   : > { %v994_v18 = vadd.f32 %v2019_v14, %v993_v17  ;;  %v2101_v19 = vpop.f32.mrb[2].mxu0 }
 0x10a   : > { %v1005_v20 = vadd.f32 %v2101_v19, %v2019_v14  ;;  %v996_v21 = vpop.f32.mrb[3].mxu0  ;;  %v1033_v22 = vsel %vm1026_vm2, %v1002_v16, 0.0 }
 0x10b   : > { %v997_v23 = vadd.f32 %v2019_v14, %v996_v21  ;;  %1034 = vadd.xlane.f32.xlu1 %v1033_v22  ;;  %v1027_v24 = vsel %vm1026_vm2, %v994_v18, 0.0 }
 0x10c   : > { %1028 = vadd.xlane.f32.xlu0 %v1027_v24  ;;  %v1036_v25 = vsel %vm1026_vm2, %v1005_v20, 0.0  ;;  %v2173_v24 = vld [vmem:[%s2427_s27 + $0x8] sm:$0xff]  }
 0x10d   : > { %v1030_v27 = vsel %vm1026_vm2, %v997_v23, 0.0 }
 0x10f   : > { %1037 = vadd.xlane.f32.xlu1 %v1036_v25  ;;  %v2104_v26 = vpop.f32.mrb[4].mxu0  ;;  %v2174_v25 = vld [vmem:[%s2427_s27 + $0x10] sm:$0xff]  }
 0x110   : > { %v1009_v28 = vpop.f32.mrb[5].mxu0  ;;  %1031 = vadd.xlane.f32.xlu0 %v1030_v27  ;;  %v1018_v32 = vadd.f32 %v2104_v26, %v2019_v14  ;;  %v2175_v26 = vld [vmem:[%s2427_s27 + $0x18] sm:$0xff]   ;;  %v2272_v27 = vmov 16  }
 0x111   : > { %v1010_v29 = vadd.f32 %v2019_v14, %v1009_v28  ;;  %v2105_v30 = vpop.f32.mrb[6].mxu0  ;;  %2170 = vset.pattern.permute.xlu1 %v2272_v27  ;;  %2169 = vset.pattern.permute.xlu0 %v2272_v27 }
 0x112   : > { %v1012_v31 = vpop.f32.mrb[7].mxu0  ;;  %v1021_v35 = vadd.f32 %v2105_v30, %v2019_v14  ;;  %v1045_v37 = vsel %vm1026_vm2, %v1018_v32, 0.0 }
 0x113   : > { %v1013_v33 = vadd.f32 %v2019_v14, %v1012_v31  ;;  %v1039_v34 = vsel %vm1026_vm2, %v1010_v29, 0.0 }
 0x114   : > { %1040 = vadd.xlane.f32.xlu0 %v1039_v34  ;;  %v1048_v38 = vsel %vm1026_vm2, %v1021_v35, 0.0 }
 0x115   : > { %v1042_v36 = vsel %vm1026_vm2, %v1013_v33, 0.0 }
 0x116   : > { %1043 = vadd.xlane.f32.xlu1 %v1042_v36 }
 0x118   : > { %1046 = vadd.xlane.f32.xlu0 %v1045_v37 }
 0x11a   : > { %1049 = vadd.xlane.f32.xlu1 %v1048_v38 }
 0x198   : > { %v1035_v39 = vpop.xlane.xlu1 %1034 }
 0x199   : > { %v1054_v40 = vmul.f32 0.015625, %v1035_v39  ;;  %v1029_v41 = vpop.xlane.xlu0 %1028 }
 0x19a   : > { %v1052_v42 = vmul.f32 0.015625, %v1029_v41 }
 0x19b   : > { %v2554_v43 = vsub.f32 %v1002_v16, %v1054_v40 }
 0x19c   : > { %v2556_v44 = vsub.f32 %v994_v18, %v1052_v42  ;;  %v1038_v45 = vpop.xlane.xlu1 %1037  ;;  %v2025_v42 = vld [vmem:[%s2811_s28] ss:$0 sm:$0xff]  ;;  %s2817_s28 = scalar_lea.vmem %s2763_s11, %s2405_s2 }
 0x19d   : > { %v1055_v46 = vmul.f32 0.015625, %v1038_v45  ;;  %v1032_v47 = vpop.xlane.xlu0 %1031  ;;  %v1070_v53 = vmul.f32 %v2554_v43, %v2554_v43 }
 0x19e   : > { %v1053_v48 = vmul.f32 0.015625, %v1032_v47  ;;  %v1068_v49 = vmul.f32 %v2556_v44, %v2556_v44 }
 0x19f   : > { %v2560_v50 = vsub.f32 %v1005_v20, %v1055_v46  ;;  %v1082_v61 = vsel %vm1026_vm2, %v1070_v53, 0.0 }
 0x1a0   : > { %v2562_v51 = vsub.f32 %v997_v23, %v1053_v48  ;;  %v1076_v52 = vsel %vm1026_vm2, %v1068_v49, 0.0  ;;  %v2172_v23 = vld [vmem:[%s2427_s27] sm:$0xff]   ;;  %s2816_s27 = scalar_lea.vmem %s2762_s10, %s2405_s2 }
 0x1a1   : > { %1077 = vadd.xlane.f32.xlu0 %v1076_v52  ;;  %v1041_v54 = vpop.xlane.xlu0 %1040  ;;  %v1071_v58 = vmul.f32 %v2560_v50, %v2560_v50  ;;  %2106 = vmatprep.subr.bf16.mxu1 %v2172_v23  ;;  %v2026_v48 = vld [vmem:[%s2813_s9] ss:$0 sm:$0xff]  ;;  %s2819_s9 = scalar_lea.vmem %s2818_s23, %s2405_s2 }
 0x1a2   : > { %v1056_v55 = vmul.f32 0.015625, %v1041_v54  ;;  %v1069_v56 = vmul.f32 %v2562_v51, %v2562_v51  ;;  %2107 = vmatpush3.bf16.msra.mxu1 %v2172_v23 }
 0x1a3   : > { %v1044_v57 = vpop.xlane.xlu1 %1043  ;;  %v1085_v10 = vsel %vm1026_vm2, %v1071_v58, 0.0  ;;  %2108 = vmatprep.subr.bf16.mxu1 %v2173_v24 }
 0x1a4   : > { %v2571_v59 = vsub.f32 %v1010_v29, %v1056_v55  ;;  %v1057_v60 = vmul.f32 0.015625, %v1044_v57  ;;  %v1079_v62 = vsel %vm1026_vm2, %v1069_v56, 0.0 }
 0x1a5   : > { %1083 = vadd.xlane.f32.xlu0 %v1082_v61  ;;  %1080 = vadd.xlane.f32.xlu1 %v1079_v62  ;;  %v1047_v63 = vpop.xlane.xlu0 %1046 }
 0x1a6   : > { %v2575_v0 = vsub.f32 %v1013_v33, %v1057_v60  ;;  %v1058_v1 = vmul.f32 0.015625, %v1047_v63  ;;  %v1072_v5 = vmul.f32 %v2571_v59, %v2571_v59  ;;  %2109 = vmatpush3.bf16.msra.mxu1 %v2173_v24 }
 0x1a7   : > { %v1050_v9 = vpop.xlane.xlu1 %1049  ;;  %2110 = vmatprep.subr.bf16.mxu1 %v2174_v25 }
 0x1a8   : > { %v2580_v13 = vsub.f32 %v1018_v32, %v1058_v1  ;;  %v1059_v14 = vmul.f32 0.015625, %v1050_v9  ;;  %v1088_v15 = vsel %vm1026_vm2, %v1072_v5, 0.0  ;;  %v1073_v16 = vmul.f32 %v2575_v0, %v2575_v0 }
 0x1a9   : > { %1086 = vadd.xlane.f32.xlu1 %v1085_v10  ;;  %1089 = vadd.xlane.f32.xlu0 %v1088_v15 }
 0x1aa   : > { %v2585_v17 = vsub.f32 %v1021_v35, %v1059_v14  ;;  %v1074_v18 = vmul.f32 %v2580_v13, %v2580_v13  ;;  %v1091_v19 = vsel %vm1026_vm2, %v1073_v16, 0.0  ;;  %2111 = vmatpush3.bf16.msra.mxu1 %v2174_v25 }
 0x1ab   : > { %2112 = vmatprep.subr.bf16.mxu1 %v2175_v26 }
 0x1ac   : > { %v1094_v20 = vsel %vm1026_vm2, %v1074_v18, 0.0  ;;  %v1075_v21 = vmul.f32 %v2585_v17, %v2585_v17 }
 0x1ad   : > { %1092 = vadd.xlane.f32.xlu1 %v1091_v19  ;;  %1095 = vadd.xlane.f32.xlu0 %v1094_v20 }
 0x1ae   : > { %v1097_v22 = vsel %vm1026_vm2, %v1075_v21, 0.0  ;;  %2113 = vmatpush3.bf16.msra.mxu1 %v2175_v26 }
 0x1b1   : > { %1098 = vadd.xlane.f32.xlu1 %v1097_v22 }
 0x1c2   : > { %1343 = vperm.xlu1 %2170, %v2497_v3  }
 0x1c3   : > { %1338 = vperm.xlu0 %2169, %v2492_v2  }
 0x1c6   : > { %1348 = vperm.xlu1 %2170, %v2502_v4  }
 0x1ca   : > { %1353 = vperm.xlu1 %2170, %v2509_v6  }
 0x1ce   : > { %1358 = vperm.xlu1 %2170, %v2514_v7  }
 0x1d2   : > { %1363 = vperm.xlu1 %2170, %v2519_v8  }
 0x1d6   : > { %1368 = vperm.xlu1 %2170, %v2529_v11  }
 0x1da   : > { %1373 = vperm.xlu1 %2170, %v2534_v12  }
 0x22e   : > { %v1078_v28 = vpop.xlane.xlu0 %1077 }
 0x22f   : > { %v1100_v29 = vmul.f32 0.015625, %v1078_v28 }
 0x231   : > { %v1108_v30 = vadd.f32 1e-05, %v1100_v29 }
 0x232   : > { %v1081_v31 = vpop.xlane.xlu1 %1080  ;;  %v1084_v32 = vpop.xlane.xlu0 %1083 }
 0x233   : > { %2182 = vrsqrt.f32 %v1108_v30  ;;  %v1101_v3 = vmul.f32 0.015625, %v1081_v31  ;;  %v1102_v2 = vmul.f32 0.015625, %v1084_v32 }
 0x235   : > { %v1109_v33 = vadd.f32 1e-05, %v1101_v3  ;;  %v1110_v4 = vadd.f32 1e-05, %v1102_v2 }
 0x236   : > { %v1087_v34 = vpop.xlane.xlu1 %1086  ;;  %v1090_v6 = vpop.xlane.xlu0 %1089 }
 0x237   : > { %2184 = vrsqrt.f32 %v1109_v33  ;;  %v1103_v7 = vmul.f32 0.015625, %v1087_v34  ;;  %v1104_v8 = vmul.f32 0.015625, %v1090_v6 }
 0x238   : > { %2186 = vrsqrt.f32 %v1110_v4 }
 0x239   : > { %v1111_v11 = vadd.f32 1e-05, %v1103_v7  ;;  %v1112_v12 = vadd.f32 1e-05, %v1104_v8 }
 0x23a   : > { %v1093_v35 = vpop.xlane.xlu1 %1092  ;;  %v1096_v36 = vpop.xlane.xlu0 %1095 }
 0x23b   : > { %2188 = vrsqrt.f32 %v1111_v11  ;;  %v1105_v37 = vmul.f32 0.015625, %v1093_v35  ;;  %v1106_v38 = vmul.f32 0.015625, %v1096_v36 }
 0x23c   : > { %2190 = vrsqrt.f32 %v1112_v12 }
 0x23d   : > { %v2183_v39 = vpop.eup %2182  ;;  %v1113_v40 = vadd.f32 1e-05, %v1105_v37  ;;  %v1114_v41 = vadd.f32 1e-05, %v1106_v38 }
 0x23e   : > { %v1099_v45 = vpop.xlane.xlu1 %1098  ;;  %v1124_v46 = vmul.f32 %v2183_v39, %v2556_v44 }
 0x23f   : > { %2192 = vrsqrt.f32 %v1113_v40  ;;  %v1107_v47 = vmul.f32 0.015625, %v1099_v45 }
 0x240   : > { %2194 = vrsqrt.f32 %v1114_v41  ;;  %v1138_v49 = vmul.f32 %v2025_v42, %v1124_v46 }
 0x241   : > { %v2185_v52 = vpop.eup %2184  ;;  %v1115_v53 = vadd.f32 1e-05, %v1107_v47 }
 0x242   : > { %v2187_v54 = vpop.eup %2186  ;;  %v1125_v55 = vmul.f32 %v2185_v52, %v2562_v51  ;;  %v2618_v56 = vadd.f32 %v2026_v48, %v1138_v49 }
 0x243   : > { %v1126_v57 = vmul.f32 %v2187_v54, %v2554_v43  ;;  %2196 = vrsqrt.f32 %v1115_v53 }
 0x244   : > { %v1139_v44 = vmul.f32 %v2025_v42, %v1125_v55  ;;  %v2027_v58 = vmul.f32 -1.442695, %v2618_v56 }
 0x245   : > { %v2189_v60 = vpop.eup %2188  ;;  %v1140_v61 = vmul.f32 %v2025_v42, %v1126_v57 }
 0x246   : > { %v2191_v62 = vpop.eup %2190  ;;  %v1127_v63 = vmul.f32 %v2189_v60, %v2560_v50  ;;  %v1153_v1 = vadd.f32 %v2026_v48, %v1139_v44  ;;  %2198 = vpow2.f32 %v2027_v58 }
 0x247   : > { %v1128_v5 = vmul.f32 %v2191_v62, %v2571_v59  ;;  %v2624_v9 = vadd.f32 %v2026_v48, %v1140_v61  ;;  %v2176_v62 = vld [vmem:[%s2441_s1] sm:$0xff]  }
 0x248   : > { %v2028_v51 = vmul.f32 -1.442695, %v1153_v1  ;;  %v1141_v10 = vmul.f32 %v2025_v42, %v1127_v63  ;;  %v2273_v63 = vmov 0.0  }
 0x249   : > { %v2193_v14 = vpop.eup %2192  ;;  %v2029_v43 = vmul.f32 -1.442695, %v2624_v9  ;;  %v1142_v15 = vmul.f32 %v2025_v42, %v1128_v5  ;;  %2122 = vmatprep.subr.bf16.mxu0 %v2273_v63  ;;  %2130 = vmatprep.subr.bf16.mxu1 %v2273_v63  ;;  %v1344_v5 = vpop.permute.xlu1 %1343 }
 0x24a   : > { %v2195_v16 = vpop.eup %2194  ;;  %v1129_v18 = vmul.f32 %v2193_v14, %v2575_v0  ;;  %2200 = vpow2.f32 %v2028_v51  ;;  %v1155_v19 = vadd.f32 %v2026_v48, %v1141_v10  ;;  %2123 = vmatpush3.bf16.msra.mxu0 %v2176_v62  ;;  %2126 = vmatprep.mubr.msk.bf16.mxu0 %vm2274_vm3, %v2273_v63  ;;  %v2035_v14 = vld [vmem:[%s2814_s3] ss:$0 sm:$0xff] }
 0x24b   : > { %v1130_v20 = vmul.f32 %v2195_v16, %v2580_v13  ;;  %2202 = vpow2.f32 %v2029_v43  ;;  %v1156_v50 = vadd.f32 %v2026_v48, %v1142_v15  ;;  %2124 = vmatprep.subr.bf16.mxu0 %v2273_v63 }
 0x24c   : > { %v2030_v21 = vmul.f32 -1.442695, %v1155_v19  ;;  %v1143_v22 = vmul.f32 %v2025_v42, %v1129_v18 }
 0x24d   : > { %v2197_v59 = vpop.eup %2196  ;;  %v2031_v23 = vmul.f32 -1.442695, %v1156_v50  ;;  %v1144_v24 = vmul.f32 %v2025_v42, %v1130_v20  ;;  %v2648_v20 = vld [vmem:[#allocation2] sm:$0xff] }
 0x24e   : > { %v1131_v25 = vmul.f32 %v2197_v59, %v2585_v17  ;;  %2204 = vpow2.f32 %v2030_v21  ;;  %v1157_v26 = vadd.f32 %v2026_v48, %v1143_v22 }
 0x24f   : > { %2206 = vpow2.f32 %v2031_v23  ;;  %v1158_v27 = vadd.f32 %v2026_v48, %v1144_v24 }
 0x250   : > { %v2199_v28 = vpop.eup %2198  ;;  %v2032_v29 = vmul.f32 -1.442695, %v1157_v26  ;;  %v1145_v0 = vmul.f32 %v2025_v42, %v1131_v25 }
 0x251   : > { %v1184_v30 = vadd.f32 1.0, %v2199_v28  ;;  %v2033_v31 = vmul.f32 -1.442695, %v1158_v27 }
 0x252   : > { %2208 = vpow2.f32 %v2032_v29  ;;  %v1159_v13 = vadd.f32 %v2026_v48, %v1145_v0 }
 0x253   : > { %2210 = vpow2.f32 %v2033_v31 }
 0x254   : > { %v2201_v32 = vpop.eup %2200  ;;  %v2034_v3 = vmul.f32 -1.442695, %v1159_v13  ;;  %2212 = vrcp.f32 %v1184_v30 }
 0x255   : > { %v2203_v2 = vpop.eup %2202  ;;  %v1185_v33 = vadd.f32 1.0, %v2201_v32 }
 0x256   : > { %v1186_v4 = vadd.f32 1.0, %v2203_v2  ;;  %2214 = vpow2.f32 %v2034_v3 }
 0x257   : > { %2216 = vrcp.f32 %v1185_v33 }
 0x258   : > { %v2205_v17 = vpop.eup %2204  ;;  %2218 = vrcp.f32 %v1186_v4 }
 0x259   : > { %v2207_v34 = vpop.eup %2206  ;;  %v1187_v6 = vadd.f32 1.0, %v2205_v17 }
 0x25a   : > { %v1188_v7 = vadd.f32 1.0, %v2207_v34 }
 0x25b   : > { %2220 = vrcp.f32 %v1187_v6 }
 0x25c   : > { %v2209_v8 = vpop.eup %2208  ;;  %2222 = vrcp.f32 %v1188_v7 }
 0x25d   : > { %v1189_v11 = vadd.f32 1.0, %v2209_v8  ;;  %v2211_v12 = vpop.eup %2210 }
 0x25e   : > { %v2213_v35 = vpop.eup %2212  ;;  %v1190_v36 = vadd.f32 1.0, %v2211_v12 }
 0x25f   : > { %2224 = vrcp.f32 %v1189_v11  ;;  %v1208_v40 = vmul.f32 %v2213_v35, %v2618_v56 }
 0x260   : > { %v2215_v37 = vpop.eup %2214  ;;  %2226 = vrcp.f32 %v1190_v36 }
 0x261   : > { %v2217_v38 = vpop.eup %2216  ;;  %v1191_v39 = vadd.f32 1.0, %v2215_v37 }
 0x262   : > { %v1209_v41 = vmul.f32 %v2217_v38, %v1153_v1  ;;  %v2219_v42 = vpop.eup %2218  ;;  %v2177_v1 = vld [vmem:[%s2441_s1 + $0x8] sm:$0xff]  }
 0x263   : > { %2228 = vrcp.f32 %v1191_v39  ;;  %v1210_v47 = vmul.f32 %v2219_v42, %v2624_v9  ;;  %2125 = vmatpush3.bf16.msra.mxu0 %v2177_v1  ;;  %v1349_v9 = vpop.permute.xlu1 %1348 }
 0x264   : > { %v1216_v45 = vpack.c.bf16 %v1209_v41, %v1208_v40 }
 0x265   : > { %v2221_v46 = vpop.eup %2220 }
 0x266   : > { %2114 = vmatprep.mubr.msk.bf16.mxu1 %vm1026_vm2, %v1216_v45  ;;  %v1211_v48 = vmul.f32 %v2221_v46, %v1155_v19  ;;  %v2223_v49 = vpop.eup %2222  ;;  %v1339_v19 = vpop.permute.xlu0 %1338 }
 0x267   : > { %v1212_v54 = vmul.f32 %v2223_v49, %v1156_v50  ;;  %v1354_v51 = vpop.permute.xlu1 %1353 }
 0x268   : > { %v1217_v52 = vpack.c.bf16 %v1211_v48, %v1210_v47 }
 0x269   : > { %v2225_v53 = vpop.eup %2224 }
 0x26a   : > { %2115 = vmatmul.mubr.msk.bf16.vlgmr.msra.gmra.mrb[0].mxu1 %vm1026_vm2, %v1217_v52  ;;  %v1213_v55 = vmul.f32 %v2225_v53, %v1157_v26  ;;  %v2227_v56 = vpop.eup %2226 }
 0x26b   : > { %v1214_v58 = vmul.f32 %v2227_v56, %v1158_v27  ;;  %v1359_v10 = vpop.permute.xlu1 %1358 }
 0x26c   : > { %v1218_v57 = vpack.c.bf16 %v1213_v55, %v1212_v54 }
 0x26d   : > { %v2229_v44 = vpop.eup %2228 }
 0x26e   : > { %2118 = vmatprep.mubr.msk.bf16.mxu1 %vm1026_vm2, %v1218_v57  ;;  %v1215_v60 = vmul.f32 %v2229_v44, %v1159_v13 }
 0x26f   : > { %v1364_v43 = vpop.permute.xlu1 %1363 }
 0x270   : > { %v1219_v61 = vpack.c.bf16 %v1215_v60, %v1214_v58 }
 0x272   : > { %2119 = vmatmul.mubr.msk.bf16.gmra.mrb[4].mxu1 %vm1026_vm2, %v1219_v61 }
 0x273   : > { %2138 = vmatprep.mubr.msk.bf16.mxu1 %vm2274_vm3, %v2273_v63  ;;  %v1369_v28 = vpop.permute.xlu1 %1368 }
 0x277   : > { %v1374_v40 = vpop.permute.xlu1 %1373 }
 0x33d   : > { %v2116_v15 = vpop.f32.mrb[0].mxu1 }
 0x33e   : > { %v1314_v16 = vadd.f32 %v2116_v15, %v2035_v14  ;;  %v1305_v18 = vpop.f32.mrb[1].mxu1 }
 0x33f   : > { %v1306_v50 = vadd.f32 %v2035_v14, %v1305_v18  ;;  %v2117_v21 = vpop.f32.mrb[2].mxu1 }
 0x340   : > { %v1378_v22 = vmul.f32 %v1349_v9, %v1314_v16  ;;  %v1317_v59 = vadd.f32 %v2117_v21, %v2035_v14  ;;  %v1308_v23 = vpop.f32.mrb[3].mxu1 }
 0x341   : > { %v1309_v24 = vadd.f32 %v2035_v14, %v1308_v23  ;;  %v1376_v25 = vmul.f32 %v1339_v19, %v1306_v50 }
 0x342   : > { %v1386_v26 = vmul.f32 %v1378_v22, %v2648_v20  ;;  %v1379_v27 = vmul.f32 %v1354_v51, %v1317_v59 }
 0x343   : > { %v1377_v29 = vmul.f32 %v1344_v5, %v1309_v24  ;;  %v1384_v0 = vmul.f32 %v1376_v25, %v2648_v20 }
 0x344   : > { %v1407_v30 = vsel %vm1392_vm4, %v1386_v26, 0.0  ;;  %v1387_v31 = vmul.f32 %v1379_v27, %v2648_v20 }
 0x345   : > { %v1408_v13 = vrot.slane %v1407_v30, 4  ;;  %v1385_v32 = vmul.f32 %v1377_v29, %v2648_v20  ;;  %v1393_v3 = vsel %vm1392_vm4, %v1384_v0, 0.0  ;;  %v2120_v2 = vpop.f32.mrb[4].mxu1 }
 0x346   : > { %v1414_v33 = vsel %vm1392_vm4, %v1387_v31, 0.0  ;;  %v1394_v4 = vrot.slane %v1393_v3, 4  ;;  %v1330_v17 = vadd.f32 %v2120_v2, %v2035_v14  ;;  %v1321_v34 = vpop.f32.mrb[5].mxu1 }
 0x347   : > { %v1409_v6 = vadd.f32 %v1408_v13, %v1407_v30  ;;  %v1415_v7 = vrot.slane %v1414_v33, 4  ;;  %v1400_v8 = vsel %vm1392_vm4, %v1385_v32, 0.0  ;;  %v1322_v11 = vadd.f32 %v2035_v14, %v1321_v34  ;;  %v2121_v12 = vpop.f32.mrb[6].mxu1 }
 0x348   : > { %v1401_v35 = vrot.slane %v1400_v8, 4  ;;  %v1395_v36 = vadd.f32 %v1394_v4, %v1393_v3  ;;  %v1382_v37 = vmul.f32 %v1369_v28, %v1330_v17  ;;  %v1333_v38 = vadd.f32 %v2121_v12, %v2035_v14  ;;  %v1324_v39 = vpop.f32.mrb[7].mxu1 }
 0x349   : > { %v1410_v41 = vrot.slane %v1409_v6, 2  ;;  %v1416_v42 = vadd.f32 %v1415_v7, %v1414_v33  ;;  %v1380_v45 = vmul.f32 %v1359_v10, %v1322_v11  ;;  %v1325_v46 = vadd.f32 %v2035_v14, %v1324_v39 }
 0x34a   : > { %v1402_v47 = vadd.f32 %v1401_v35, %v1400_v8  ;;  %v1396_v48 = vrot.slane %v1395_v36, 2  ;;  %v1390_v49 = vmul.f32 %v1382_v37, %v2648_v20  ;;  %v1383_v52 = vmul.f32 %v1374_v40, %v1333_v38  ;;  %v2044_v38 = vld [vmem:[%s2815_s4] ss:$0 sm:$0xff]  ;;  %s2822_s4 = scalar_lea.vmem %s2767_s15, %s2405_s2 }
 0x34b   : > { %v1411_v53 = vadd.f32 %v1410_v41, %v1409_v6  ;;  %v1417_v54 = vrot.slane %v1416_v42, 2  ;;  %v1388_v55 = vmul.f32 %v1380_v45, %v2648_v20  ;;  %v1381_v56 = vmul.f32 %v1364_v43, %v1325_v46  ;;  %v2045_v46 = vld [vmem:[%s2816_s27] ss:$0 sm:$0xff]  ;;  %s1705_s27 = scalar_select %p843_p4, 1, 0 }
 0x34c   : > { %v1403_v57 = vrot.slane %v1402_v47, 2  ;;  %v1397_v44 = vadd.f32 %v1396_v48, %v1395_v36  ;;  %v1435_v58 = vsel %vm1392_vm4, %v1390_v49, 0.0  ;;  %v1391_v60 = vmul.f32 %v1383_v52, %v2648_v20 }
 0x34d   : > { %v1418_v61 = vadd.f32 %v1417_v54, %v1416_v42  ;;  %v1436_v62 = vrot.slane %v1435_v58, 4  ;;  %v1421_v1 = vsel %vm1392_vm4, %v1388_v55, 0.0  ;;  %v1412_v14 = vrot.slane %v1411_v53, 1 }
 0x34e   : > { %v1404_v5 = vadd.f32 %v1403_v57, %v1402_v47  ;;  %v1398_v9 = vrot.slane %v1397_v44, 1  ;;  %v1422_v51 = vrot.slane %v1421_v1, 4  ;;  %v1442_v10 = vsel %vm1392_vm4, %v1391_v60, 0.0  ;;  %v2179_v60 = vld [vmem:[%s2458_s22 + $0x8] sm:$0xff]  }
 0x34f   : > { %v1437_v15 = vadd.f32 %v1436_v62, %v1435_v58  ;;  %v1443_v16 = vrot.slane %v1442_v10, 4  ;;  %v1419_v18 = vrot.slane %v1418_v61, 1  ;;  %v1389_v50 = vmul.f32 %v1381_v56, %v2648_v20  ;;  %v2178_v58 = vld [vmem:[%s2458_s22] sm:$0xff]   ;;  %v2181_v62 = vld [vmem:[%s2458_s22 + $0x18] sm:$0xff]  }
 0x350   : > { %v1405_v43 = vrot.slane %v1404_v5, 1  ;;  %v1423_v19 = vadd.f32 %v1422_v51, %v1421_v1  ;;  %v1399_v21 = vadd.f32 %v1398_v9, %v1397_v44  ;;  %v1413_v26 = vadd.f32 %v1412_v14, %v1411_v53  ;;  %2131 = vmatpush3.bf16.msra.mxu1 %v2178_v58 }
 0x351   : > { %v1444_v22 = vadd.f32 %v1443_v16, %v1442_v10  ;;  %v1438_v23 = vrot.slane %v1437_v15, 2  ;;  %v1428_v25 = vsel %vm1392_vm4, %v1389_v50, 0.0  ;;  %v1420_v29 = vadd.f32 %v1419_v18, %v1418_v61  ;;  %2132 = vmatprep.subr.bf16.mxu1 %v2273_v63  ;;  %v2180_v61 = vld [vmem:[%s2458_s22 + $0x10] sm:$0xff]   ;;  %v2049_v10 = vld [vmem:[%s2817_s28] ss:$0 sm:$0xff] }
 0x352   : > { %v1406_v59 = vadd.f32 %v1405_v43, %v1404_v5  ;;  %v1424_v24 = vrot.slane %v1423_v19, 2  ;;  %v1429_v28 = vrot.slane %v1428_v25, 4 }
 0x353   : > { %v1445_v27 = vrot.slane %v1444_v22, 2  ;;  %v1439_v32 = vadd.f32 %v1438_v23, %v1437_v15  ;;  %v2050_v15 = vld [vmem:[%s2819_s9] ss:$0 sm:$0xff] }
 0x354   : > { %v1465_v0 = vsel %vm1464_vm5, %v1406_v59, %v1399_v21  ;;  %v1425_v30 = vadd.f32 %v1424_v24, %v1423_v19  ;;  %v1430_v13 = vadd.f32 %v1429_v28, %v1428_v25  ;;  %2133 = vmatpush3.bf16.msra.mxu1 %v2179_v60  ;;  %v2052_v59 = vld [vmem:[%s2820_s5] ss:$0 sm:$0xff] }
 0x355   : > { %v1467_v31 = vsel %vm1466_vm6, %v1413_v26, %v1465_v0  ;;  %v1446_v33 = vadd.f32 %v1445_v27, %v1444_v22  ;;  %v1440_v6 = vrot.slane %v1439_v32, 1  ;;  %2134 = vmatprep.subr.bf16.mxu1 %v2273_v63 }
 0x356   : > { %v1426_v3 = vrot.slane %v1425_v30, 1  ;;  %v1469_v2 = vsel %vm1468_vm7, %v1420_v29, %v1467_v31  ;;  %v1431_v4 = vrot.slane %v1430_v13, 2 }
 0x357   : > { %v1447_v8 = vrot.slane %v1446_v33, 1  ;;  %v1441_v35 = vadd.f32 %v1440_v6, %v1439_v32 }
 0x358   : > { %v1427_v17 = vadd.f32 %v1426_v3, %v1425_v30  ;;  %v1432_v34 = vadd.f32 %v1431_v4, %v1430_v13  ;;  %2135 = vmatpush3.bf16.msra.mxu1 %v2180_v61  ;;  %v2058_v4 = vld [vmem:[%s2822_s4] ss:$0 sm:$0xff] }
 0x359   : > { %v1448_v36 = vadd.f32 %v1447_v8, %v1446_v33  ;;  %2136 = vmatprep.subr.bf16.mxu1 %v2273_v63 }
 0x35a   : > { %v1471_v7 = vsel %vm1470_vm8, %v1427_v17, %v1469_v2  ;;  %v1433_v11 = vrot.slane %v1432_v34, 1 }
 0x35c   : > { %v1434_v12 = vadd.f32 %v1433_v11, %v1432_v34  ;;  %2137 = vmatpush3.bf16.msra.mxu1 %v2181_v62  ;;  %v2059_v34 = vld [vmem:[%s895_s26] ss:$0 sm:$0xff] }
 0x35e   : > { %v1473_v37 = vsel %vm1472_vm9, %v1434_v12, %v1471_v7 }
 0x35f   : > { %v1475_v39 = vsel %vm1474_vm10, %v1441_v35, %v1473_v37  ;;  %v1706_v35 = vstv %s1705_s27 }
 0x360   : > { %v1477_v40 = vsel %vm1476_vm11, %v1448_v36, %v1475_v39  ;;  %vm1707_vm12 = vcmp.eq.s32.totalorder %v1706_v35, 1 }
 0x361   : > { %v1479_v41 = vmul.f32 %v2044_v38, %v1477_v40 }
 0x363   : > { %v1480_v42 = vadd.f32 %v1479_v41, %v2648_v20 }
 0x365   : > { %v1481_v45 = vpack.c.bf16 %v1480_v42, %v1480_v42 }
 0x367   : > { %2127 = vmatmul.mubr.msk.bf16.vlgmr.msra.gmra.mrb[8].mxu0 %vm1392_vm4, %v1481_v45 }
 0x43a   : > { %v1542_v47 = vpop.f32.mrb[8].mxu0 }
 0x43b   : > { %v1543_v48 = vadd.f32 %v2045_v46, %v1542_v47  ;;  %v2128_v49 = vpop.f32.mrb[9].mxu0  ;;  %v1732_v46 = vlaneseq (%p843_p4) }
 0x43c   : > { %v1545_v52 = vpop.f32.mrb[10].mxu0 }
 0x43d   : > { %v2129_v53 = vpop.f32.mrb[11].mxu0  ;;  %v1550_v54 = vsel %vm1026_vm2, %v1543_v48, 0.0  ;;  %v1733_v49 = vshrl.u32 (%p843_p4), %v1732_v46, 7 }
 0x43e   : > { %1551 = vadd.xlane.f32.xlu1 %v1550_v54  ;;  %v1730_v53 = vld [vmem:[%s904_s21] sm:$0x1] (%p843_p4) }
 0x4cb   : > { %v1552_v20 = vpop.xlane.xlu1 %1551 }
 0x4cc   : > { %v1553_v55 = vmul.f32 0.015625, %v1552_v20  ;;  %v1734_v20 = vsub.s32 (%p843_p4), 0, %v1733_v49 }
 0x4ce   : > { %v1554_v56 = vsub.f32 %v1543_v48, %v1553_v55 }
 0x4d0   : > { %v1555_v57 = vmul.f32 %v1554_v56, %v1554_v56 }
 0x4d2   : > { %v1556_v44 = vsel %vm1026_vm2, %v1555_v57, 0.0 }
 0x4d3   : > { %1557 = vadd.xlane.f32.xlu0 %v1556_v44 }
 0x560   : > { %v1558_v1 = vpop.xlane.xlu0 %1557 }
 0x561   : > { %v1559_v5 = vmul.f32 0.015625, %v1558_v1 }
 0x563   : > { %v1560_v9 = vadd.f32 1e-05, %v1559_v5 }
 0x565   : > { %2230 = vrsqrt.f32 %v1560_v9 }
 0x56f   : > { %v2231_v51 = vpop.eup %2230 }
 0x570   : > { %v1562_v14 = vmul.f32 %v2231_v51, %v1554_v56 }
 0x572   : > { %v1569_v16 = vmul.f32 %v2049_v10, %v1562_v14  ;;  %v2062_v14 = vld [vmem:[%s898_s29] ss:$0 sm:$0xff] (%p843_p4) }
 0x574   : > { %v1576_v63 = vadd.f32 %v2050_v15, %v1569_v16 }
 0x576   : > { %v2051_v18 = vmul.f32 -1.442695, %v1576_v63 }
 0x578   : > { %2232 = vpow2.f32 %v2051_v18 }
 0x582   : > { %v2233_v43 = vpop.eup %2232 }
 0x583   : > { %v1580_v19 = vadd.f32 1.0, %v2233_v43 }
 0x585   : > { %2234 = vrcp.f32 %v1580_v19 }
 0x58f   : > { %v2235_v50 = vpop.eup %2234 }
 0x590   : > { %v1583_v21 = vmul.f32 %v2235_v50, %v1576_v63  ;;  %v2063_v63 = vld [vmem:[%s901_s24] ss:$0 sm:$0xff] (%p843_p4) }
 0x592   : > { %v1584_v22 = vpack.c.bf16 %v1583_v21, %v1583_v21 }
 0x594   : > { %2139 = vmatmul.mubr.msk.bf16.vlgmr.msra.gmra.mrb[8].mxu1 %vm1026_vm2, %v1584_v22 }
 0x667   : > { %v1661_v23 = vpop.f32.mrb[8].mxu1 }
 0x668   : > { %v1662_v24 = vadd.f32 %v2052_v59, %v1661_v23  ;;  %v2140_v25 = vpop.f32.mrb[9].mxu1  ;;  %v1773_v23 = vld [vmem:[#allocation2] sm:$0xff] (%p843_p4) }
 0x669   : > { %v1664_v26 = vpop.f32.mrb[10].mxu1 }
 0x66a   : > { %v2141_v27 = vpop.f32.mrb[11].mxu1  ;;  %v1670_v28 = vsel %vm1392_vm4, %v1662_v24, 0.0 }
 0x66b   : > { %1671 = vadd.xlane.f32.xlu0 %v1670_v28 }
 0x6f8   : > { %v1672_v29 = vpop.xlane.xlu0 %1671 }
 0x6f9   : > { %v1674_v0 = vmul.f32 0.03125, %v1672_v29 }
 0x6fb   : > { %v1675_v30 = vsub.f32 %v1662_v24, %v1674_v0 }
 0x6fd   : > { %v1676_v31 = vmul.f32 %v1675_v30, %v1675_v30 }
 0x6ff   : > { %v1677_v13 = vsel %vm1392_vm4, %v1676_v31, 0.0 }
 0x700   : > { %1678 = vadd.xlane.f32.xlu1 %v1677_v13 }
 0x78d   : > { %v1679_v32 = vpop.xlane.xlu1 %1678 }
 0x78e   : > { %v1680_v3 = vmul.f32 0.03125, %v1679_v32 }
 0x790   : > { %v1681_v2 = vadd.f32 1e-05, %v1680_v3 }
 0x792   : > { %2236 = vrsqrt.f32 %v1681_v2 }
 0x79c   : > { %v2237_v33 = vpop.eup %2236 }
 0x79d   : > { %v1683_v17 = vmul.f32 %v2237_v33, %v1675_v30 }
 0x79f   : > { %v1690_v6 = vmul.f32 %v2058_v4, %v1683_v17 }
 0x7a1   : > { %v1697_v7 = vadd.f32 %v2059_v34, %v1690_v6 }
 0x7a3   : > { %v2060_v8 = vmul.f32 -1.442695, %v1697_v7 }
 0x7a5   : > { %2238 = vpow2.f32 %v2060_v8 }
 0x7af   : > { %v2239_v11 = vpop.eup %2238 }
 0x7b0   : > { %v1701_v12 = vadd.f32 1.0, %v2239_v11 }
 0x7b2   : > { %2240 = vrcp.f32 %v1701_v12 }
 0x7ba   : > { %1714 = sbr.rel (!%p843_p4) target bundleno = 2080 (0x820), region = 108 }
 0x7bc   : > { %v2241_v36 = vpop.eup %2240 }
 0x7bd   : > { %v1704_v37 = vmul.f32 %v2241_v36, %v1697_v7 }
 0x7bf   : > { %v1708_v38 = vsel %vm1707_vm12, %v1704_v37, %v1662_v24 }
 0x7c0   : > { %1710 = vst.msk [vmem:[#allocation3] sm:$0xff] %vm1392_vm4, %v1708_v38 }
 0x7c7   : > { %v1715_v39 = vld [vmem:[#allocation3] sm:$0xff] }
 0x7c8   : > { %v1722_v40 = vsel %vm1392_vm4, %v1715_v39, 0.0 }
 0x7c9   : > { %v1723_v41 = vrot.slane %v1722_v40, 4 }
 0x7cb   : > { %v1724_v42 = vadd.f32 %v1723_v41, %v1722_v40 }
 0x7cd   : > { %v1725_v45 = vrot.slane %v1724_v42, 2 }
 0x7cf   : > { %v1726_v47 = vadd.f32 %v1725_v45, %v1724_v42 }
 0x7d1   : > { %v1727_v48 = vrot.slane %v1726_v47, 1 }
 0x7d3   : > { %v1728_v52 = vadd.f32 %v1727_v48, %v1726_v47 }
 0x7d5   : > { %v1729_v54 = vmul.f32 0.125, %v1728_v52 }
 0x7d7   : > { %v1731_v55 = vmul.f32 %v1730_v53, %v1729_v54 }
 0x7d9   : > { %v1735_v56 = vrot.slane %v1731_v55, %v1734_v20 }
 0x7db   : > { %v1736_v57 = vsub.f32 %v1715_v39, %v1735_v56 }
 0x7dd   : > { %v1737_v44 = vmul.f32 %v1736_v57, %v1736_v57  ;;  %v1754_v15 = vmul.f32 %v2062_v14, %v1736_v57 }
 0x7df   : > { %v1739_v58 = vsel %vm1392_vm4, %v1737_v44, 0.0 }
 0x7e0   : > { %v1740_v60 = vrot.slane %v1739_v58, 4 }
 0x7e2   : > { %v1741_v61 = vadd.f32 %v1740_v60, %v1739_v58 }
 0x7e4   : > { %v1742_v62 = vrot.slane %v1741_v61, 2 }
 0x7e6   : > { %v1743_v1 = vadd.f32 %v1742_v62, %v1741_v61 }
 0x7e8   : > { %v1744_v5 = vrot.slane %v1743_v1, 1 }
 0x7ea   : > { %v1745_v9 = vadd.f32 %v1744_v5, %v1743_v1 }
 0x7ec   : > { %v1746_v51 = vmul.f32 0.125, %v1745_v9 }
 0x7ee   : > { %v1755_v10 = vadd.f32 1e-05, %v1746_v51 }
 0x7f0   : > { %2242 = vrsqrt.f32 %v1755_v10 }
 0x7fa   : > { %v2243_v16 = vpop.eup %2242 }
 0x7fb   : > { %v1757_v18 = vmul.f32 %v2243_v16, %v1754_v15 }
 0x7fd   : > { %v1765_v43 = vadd.f32 %v2063_v63, %v1757_v18 }
 0x7ff   : > { %v2064_v19 = vmul.f32 -1.442695, %v1765_v43 }
 0x801   : > { %2244 = vpow2.f32 %v2064_v19 }
 0x80b   : > { %v2245_v50 = vpop.eup %2244 }
 0x80c   : > { %v1769_v21 = vadd.f32 1.0, %v2245_v50 }
 0x80e   : > { %2246 = vrcp.f32 %v1769_v21 }
 0x818   : > { %v2247_v22 = vpop.eup %2246 }
 0x819   : > { %v1772_v59 = vmul.f32 %v2247_v22, %v1765_v43 }
 0x81b   : > { %v1774_v24 = vmul.f32 0.8, %v1772_v59 }
 0x81d   : > { %v1775_v25 = vadd.f32 %v1774_v24, %v1773_v23 }
 0x81f   : > { %1776 = vst.msk [vmem:[#allocation2] sm:$0xff] %vm1392_vm4, %v1775_v25 }
 0x820 PF: > { %s2825_s29 = sld [smem:[#allocation4_spill]] }
 0x826   : > { %p1777_p6 = scmp.eq.s32.totalorder %s2825_s29, 1 }
 0x827   : > { %v1782_v26 = vld [vmem:[#allocation2] sm:$0xff] (%p1777_p6)  ;;  %v1783_v27 = vld [vmem:[#allocation3] sm:$0xff] (%p1777_p6)  ;;  %s2826_s9 = sld [smem:[#allocation20_spill]] (%p1777_p6) }
 0x828   : > { %1781 = sbr.rel (!%p1777_p6) target bundleno = 2095 (0x82f), region = 112  ;;  %v1784_v28 = vmul.f32 (%p1777_p6), 0.8, %v1783_v27 }
 0x82a   : > { %v1785_v29 = vadd.f32 (%p1777_p6), %v1784_v28, %v1782_v26 }
 0x82d   : > { %1786 = vst.msk [vmem:[%s2826_s9] sm:$0xff] (%p1777_p6), %vm1392_vm4, %v1785_v29 }
 0x82f PF: > { %s2827_s22 = sld [smem:[#allocation6_spill]]  ;;  %s2828_s1 = sld [smem:[#allocation5_spill]] }
 0x835   : > { %s30_s23 = sadd.s32 1, %s2827_s22   ;;  %s2829_s22 = sld [smem:[#allocation7_spill]] }
 0x836   : > { %p27_p7 = scmp.ge.s32.totalorder %s30_s23, 4  }
 0x838   :  { %29 = sbr.rel (!%p27_p7) target bundleno = 14 (0xe), region = 194 }

</bundles_post_ra>
